<compile_context>
chip_gen: v7x
topology: tpu7x:2x2x1
jax: 0.10.0
libtpu: 0.0.40
codegen_flags: <defaults>
</compile_context>

<pallas_src>
from functools import partial

import jax
import jax.numpy as jnp
from jax.experimental import pallas as pl
from jax.experimental.pallas import tpu as pltpu


def _round_up(x, m):
    return (x + m - 1) // m * m


# --------------------------------------------------------------------------- #
# Kernel
# --------------------------------------------------------------------------- #
def fused_sage_kernel(a_ref, xk_ref, xi_ref, invdeg_ref,
                      wl1_ref, wr1_ref, b1_ref,
                      wl2_ref, wr2_ref, b2_ref,
                      o_ref,
                      acc1_ref, acc2_ref, h_ref):
    p = pl.program_id(0)      # 0 = layer-1 pass, 1 = layer-2 pass
    i = pl.program_id(1)      # output-row tile
    k = pl.program_id(2)      # reduction tile over A's columns
    nk = pl.num_programs(2)
    tm = acc1_ref.shape[0]
    tk = a_ref.shape[1]

    # One-time defensive init: the output block is parked at (0,0) during phase 0,
    # make sure any early write-back flushes zeros instead of uninitialized VMEM.
    @pl.when(jnp.logical_and(jnp.logical_and(p == 0, i == 0), k == 0))
    def _init_out():
        o_ref[...] = jnp.zeros_like(o_ref)

    # int8 edge counts -> bf16 MXU operand (VPU cast, hidden under the A DMA).
    a_bf = a_ref[...].astype(jnp.float32).astype(jnp.bfloat16)

    # ------------------ phase 0: layer-1 aggregation  sum_j A[i,j] x_j --------
    @pl.when(jnp.logical_and(p == 0, k == 0))
    def _zero_acc1():
        acc1_ref[...] = jnp.zeros_like(acc1_ref)

    @pl.when(p == 0)
    def _l1_accumulate():
        acc1_ref[...] += jnp.dot(a_bf, xk_ref[...],
                                 preferred_element_type=jnp.float32)

    # phase-0 finalize: mean -> lin_l1 + lin_r1 + b1 -> ReLU -> h (kept in VMEM).
    @pl.when(jnp.logical_and(p == 0, k == nk - 1))
    def _l1_finalize():
        mean1 = (acc1_ref[...] * invdeg_ref[...]).astype(jnp.bfloat16)
        h = jnp.dot(mean1, wl1_ref[...], preferred_element_type=jnp.float32)
        h += jnp.dot(xi_ref[...], wr1_ref[...], preferred_element_type=jnp.float32)
        h += b1_ref[...]
        h = jnp.maximum(h, 0.0)            # ReLU; dropout = identity (inference)
        row0 = pl.multiple_of(i * tm, tm)
        h_ref[pl.ds(row0, tm), :] = h.astype(h_ref.dtype)

    # ------------------ phase 1: layer-2 aggregation  sum_j A[i,j] h_j --------
    @pl.when(jnp.logical_and(p == 1, k == 0))
    def _zero_acc2():
        acc2_ref[...] = jnp.zeros_like(acc2_ref)

    @pl.when(p == 1)
    def _l2_accumulate():
        col0 = pl.multiple_of(k * tk, tk)
        acc2_ref[...] += jnp.dot(a_bf, h_ref[pl.ds(col0, tk), :],
                                 preferred_element_type=jnp.float32)

    # phase-1 finalize: mean -> lin_l2 + lin_r2 + b2 -> ReLU -> output tile.
    @pl.when(jnp.logical_and(p == 1, k == nk - 1))
    def _l2_finalize():
        row0 = pl.multiple_of(i * tm, tm)
        mean2 = (acc2_ref[...] * invdeg_ref[...]).astype(jnp.bfloat16)
        out = jnp.dot(mean2, wl2_ref[...], preferred_element_type=jnp.float32)
        out += jnp.dot(h_ref[pl.ds(row0, tm), :], wr2_ref[...],
                       preferred_element_type=jnp.float32)
        out += b2_ref[...]
        o_ref[...] = jnp.maximum(out, 0.0).astype(o_ref.dtype)


# --------------------------------------------------------------------------- #
# Wrapper / glue
# --------------------------------------------------------------------------- #
def _pick_tile(n_pad):
    if n_pad <= 512:
        return n_pad
    if n_pad % 512 == 0:
        return 512
    if n_pad % 256 == 0:
        return 256
    return 128


def _pick_vmem_limit(n_pad, tm, tk, din_p, dh_p, dout_p):
    """Generation-aware VMEM budget + fit guard for the resident h scratch."""
    try:
        info = pltpu.get_tpu_info()
        phys = int(getattr(info, "vmem_capacity_bytes", 64 * 1024 * 1024))
    except Exception:
        phys = 64 * 1024 * 1024          # conservative (v7x per-TC)

    persistent = (n_pad * dh_p * 2                      # h (bf16)
                  + tm * din_p * 4 + tm * dh_p * 4)     # acc1, acc2 (f32)
    blocks = 2 * (tm * tk                               # A int8 (double-buffered)
                  + (tk + tm) * din_p * 2               # X views (bf16)
                  + tm * 4                              # inv_deg
                  + tm * dout_p * 4)                    # output block
    weights = 2 * (2 * din_p * dh_p * 2 + 2 * dh_p * dout_p * 2
                   + (dh_p + dout_p) * 4)
    cast_tmp = tm * tk * (4 + 2)                        # in-kernel int8->f32->bf16 temps
    need = persistent + blocks + weights + cast_tmp

    limit = min(int(phys * 0.85), max(need + (32 << 20), 64 << 20))
    if need > limit:
        raise ValueError(
            f"Graph too large for VMEM-resident hidden activations: need "
            f"~{need >> 20} MiB, VMEM budget {limit >> 20} MiB "
            f"(physical {phys >> 20} MiB). "
            "# TODO(synk): spill h to HBM (two-call pipeline) for very large graphs.")
    return limit


@partial(jax.jit, static_argnames=("d_out",))
def gnn_forward(x, a_counts, inv_deg, padded_params, *, d_out):
    """Fused two-layer GraphSAGE forward.

    x            : [N, Din] f32 node features
    a_counts     : [n_pad, n_pad] int8 edge counts (A[i, j] = #edges j->i)
    inv_deg      : [n_pad, 1] f32, 1/max(deg_in, 1)
    padded_params: bf16/f32 padded weights (built once by prepare_params)
    """
    wl1_p, wr1_p, b1_p, wl2_p, wr2_p, b2_p = padded_params
    n, d_in = x.shape
    n_pad = a_counts.shape[0]
    din_p, dh_p = wl1_p.shape
    dout_p = wl2_p.shape[1]
    assert n_pad % 128 == 0 and n_pad >= n and d_in <= din_p

    tm = _pick_tile(n_pad)
    tk = tm
    assert n_pad % tm == 0

    # Only the (small) per-call node features are padded/cast inside the jit.
    x_p = jnp.zeros((n_pad, din_p), jnp.bfloat16).at[:n, :d_in].set(
        x.astype(jnp.bfloat16))

    ni = n_pad // tm
    grid = (2, ni, n_pad // tk)
    const = lambda p, i, k: (0, 0)

    flops = 2 * (n_pad * n_pad * din_p          # layer-1 aggregation A @ X
                 + n_pad * n_pad * dh_p         # layer-2 aggregation A @ h
                 + 2 * n_pad * din_p * dh_p     # lin_l1 + lin_r1
                 + 2 * n_pad * dh_p * dout_p)   # lin_l2 + lin_r2
    bytes_accessed = (2 * n_pad * n_pad                 # A (int8), once per phase
                      + ni * n_pad * din_p * 2          # X k-tiles re-read per row tile
                      + n_pad * din_p * 2               # X row tiles
                      + 2 * n_pad * 4                   # inv_deg (both phases)
                      + 2 * (2 * din_p * dh_p + 2 * dh_p * dout_p) * 2
                      + n_pad * dout_p * 4)             # output

    vmem_limit = _pick_vmem_limit(n_pad, tm, tk, din_p, dh_p, dout_p)

    out = pl.pallas_call(
        fused_sage_kernel,
        out_shape=jax.ShapeDtypeStruct((n_pad, dout_p), jnp.float32),
        grid_spec=pltpu.PrefetchScalarGridSpec(
            num_scalar_prefetch=0,
            grid=grid,
            in_specs=[
                pl.BlockSpec((tm, tk), lambda p, i, k: (i, k)),               # A counts
                pl.BlockSpec((tk, din_p), lambda p, i, k: ((1 - p) * k, 0)),  # X (k tiles)
                pl.BlockSpec((tm, din_p), lambda p, i, k: ((1 - p) * i, 0)),  # X (row tiles)
                pl.BlockSpec((tm, 1), lambda p, i, k: (i, 0)),                # 1/deg
                pl.BlockSpec((din_p, dh_p), const),                           # W_l1
                pl.BlockSpec((din_p, dh_p), const),                           # W_r1
                pl.BlockSpec((1, dh_p), const),                               # b1
                pl.BlockSpec((dh_p, dout_p), const),                          # W_l2
                pl.BlockSpec((dh_p, dout_p), const),                          # W_r2
                pl.BlockSpec((1, dout_p), const),                             # b2
            ],
            # Output block is parked at (0,0) during phase 0 (zero-initialized
            # once), then tracks the row tile in phase 1.
            out_specs=pl.BlockSpec((tm, dout_p), lambda p, i, k: (i * p, 0)),
            scratch_shapes=[
                pltpu.VMEM((tm, din_p), jnp.float32),   # layer-1 accumulator
                pltpu.VMEM((tm, dh_p), jnp.float32),    # layer-2 accumulator
                pltpu.VMEM((n_pad, dh_p), jnp.bfloat16),  # hidden activations h
            ],
        ),
        compiler_params=pltpu.CompilerParams(
            # Row axis must stay sequential: phase 1 reads h rows produced by
            # phase 0 for ALL row tiles (shared VMEM scratch).
            dimension_semantics=("arbitrary", "arbitrary", "arbitrary"),
            vmem_limit_bytes=vmem_limit,
        ),
        cost_estimate=pl.CostEstimate(flops=flops, transcendentals=0,
                                      bytes_accessed=bytes_accessed),
    )(a_counts, x_p, x_p, inv_deg, wl1_p, wr1_p, b1_p, wl2_p, wr2_p, b2_p)

    return out[:n, :d_out]


def build_graph_operands(edge_index, num_nodes):
    """Static, once-per-graph adjacency build (plain JAX, outside the jitted fwd).

    Returns int8 edge counts [n_pad, n_pad] and f32 inv_deg [n_pad, 1].
    A[i, j] = (#edges j->i); padded rows/cols stay zero so padding never leaks.
    # TODO(synk): counts > 127 (extreme multigraphs) would need int16/bf16 storage.
    """
    n_pad = _round_up(max(num_nodes, 1), 128)
    if n_pad > 512:
        n_pad = _round_up(n_pad, 512)     # guarantee 512-wide tiles for large graphs
    src, dst = edge_index[0], edge_index[1]
    counts = jnp.zeros((n_pad, n_pad), jnp.float32).at[dst, src].add(1.0)
    deg = counts.sum(axis=1, keepdims=True)
    inv_deg = (1.0 / jnp.maximum(deg, 1.0)).astype(jnp.float32)
    return counts.astype(jnp.int8), inv_deg


def prepare_params(params, d_in):
    """Once-per-model padding + bf16 cast of the SAGE weights (hoisted out of jit)."""
    (wl1, wr1, b1), (wl2, wr2, b2) = params
    d_hid = wl1.shape[1]
    d_out = wl2.shape[1]
    din_p = _round_up(d_in, 128)
    dh_p = _round_up(d_hid, 128)
    dout_p = _round_up(d_out, 128)
    bf = jnp.bfloat16

    def pad_w(w, r, c):
        return jnp.zeros((r, c), bf).at[:w.shape[0], :w.shape[1]].set(w.astype(bf))

    def pad_b(b, c):
        b = b.reshape(1, -1).astype(jnp.float32)
        return jnp.zeros((1, c), jnp.float32).at[:, :b.shape[1]].set(b)

    return (pad_w(wl1, din_p, dh_p), pad_w(wr1, din_p, dh_p), pad_b(b1, dh_p),
            pad_w(wl2, dh_p, dout_p), pad_w(wr2, dh_p, dout_p), pad_b(b2, dout_p))


def init_sage_params(key, d_in, d_out):
    k1, k2, k3 = jax.random.split(key, 3)
    scale = 1.0 / jnp.sqrt(jnp.float32(d_in))
    w_l = jax.random.uniform(k1, (d_in, d_out), jnp.float32, -scale, scale)
    w_r = jax.random.uniform(k2, (d_in, d_out), jnp.float32, -scale, scale)
    b = jax.random.uniform(k3, (1, d_out), jnp.float32, -scale, scale)
    return w_l, w_r, b


def reference_forward(x, adj_norm, params):
    """Pure-JAX f32 reference of the module's forward (inference)."""
    (wl1, wr1, b1), (wl2, wr2, b2) = params
    h = jnp.maximum((adj_norm @ x) @ wl1 + x @ wr1 + b1, 0.0)
    return jnp.maximum((adj_norm @ h) @ wl2 + h @ wr2 + b2, 0.0)


if __name__ == "__main__":
    N = 64            # nodes
    E = 128           # edges
    INPUT_DIM = 16
    HIDDEN_DIM = 32   # conv2 output; conv1 output is fixed at 128 by the module

    key = jax.random.PRNGKey(0)
    kx, ke, kp1, kp2 = jax.random.split(key, 4)

    x = jax.random.normal(kx, (N, INPUT_DIM), jnp.float32)
    edge_index = jax.random.randint(ke, (2, E), 0, N, jnp.int32)

    params = (
        init_sage_params(kp1, INPUT_DIM, 128),
        init_sage_params(kp2, 128, HIDDEN_DIM),
    )

    # Graph and weights are static across calls: build / pad / cast ONCE here.
    a_counts, inv_deg = build_graph_operands(edge_index, N)
    padded_params = prepare_params(params, INPUT_DIM)

    out = gnn_forward(x, a_counts, inv_deg, padded_params, d_out=HIDDEN_DIM)
    jax.block_until_ready(out)
    assert out.shape == (N, HIDDEN_DIM)

    # f32 reference on the unpadded, row-normalized adjacency.
    adj_norm = (a_counts.astype(jnp.float32) * inv_deg)[:N, :N]
    ref = reference_forward(x, adj_norm, params)
    max_err = float(jnp.max(jnp.abs(out - ref)))
    assert max_err < 0.1, f"mismatch vs f32 reference: max abs err {max_err}"

    print("KERNEL_OK")
</pallas_src>

<mosaic_0001>
module attributes {stable_mosaic.version = 11 : i64} {
  func.func @fused_sage_kernel(%arg0: i32, %arg1: i32, %arg2: i32, %arg3: memref<128x128xi8, #tpu.memory_space<vmem>>, %arg4: memref<128x128xbf16, #tpu.memory_space<vmem>>, %arg5: memref<128x128xbf16, #tpu.memory_space<vmem>>, %arg6: memref<128x1xf32, #tpu.memory_space<vmem>>, %arg7: memref<128x128xbf16, #tpu.memory_space<vmem>>, %arg8: memref<128x128xbf16, #tpu.memory_space<vmem>>, %arg9: memref<1x128xf32, #tpu.memory_space<vmem>>, %arg10: memref<128x128xbf16, #tpu.memory_space<vmem>>, %arg11: memref<128x128xbf16, #tpu.memory_space<vmem>>, %arg12: memref<1x128xf32, #tpu.memory_space<vmem>>, %arg13: memref<128x128xf32, #tpu.memory_space<vmem>>, %arg14: memref<128x128xf32, #tpu.memory_space<vmem>>, %arg15: memref<128x128xf32, #tpu.memory_space<vmem>>, %arg16: memref<128x128xbf16, #tpu.memory_space<vmem>>) attributes {dimension_semantics = [#tpu.dimension_semantics<arbitrary>, #tpu.dimension_semantics<arbitrary>, #tpu.dimension_semantics<arbitrary>], iteration_bounds = array<i64: 2, 1, 1>, scalar_prefetch = 0 : i64, scratch_operands = 3 : i64, tpu.core_type = #tpu.core_type<tc>, window_params = [{transform_indices = @transform_0, window_bounds = array<i64: 128, 128>}, {transform_indices = @transform_1, window_bounds = array<i64: 128, 128>}, {transform_indices = @transform_2, window_bounds = array<i64: 128, 128>}, {transform_indices = @transform_3, window_bounds = array<i64: 128, 1>}, {pipeline_mode = #tpu.pipeline_mode<synchronous>, transform_indices = @transform_4, window_bounds = array<i64: 128, 128>}, {pipeline_mode = #tpu.pipeline_mode<synchronous>, transform_indices = @transform_5, window_bounds = array<i64: 128, 128>}, {pipeline_mode = #tpu.pipeline_mode<synchronous>, transform_indices = @transform_6, window_bounds = array<i64: 1, 128>}, {pipeline_mode = #tpu.pipeline_mode<synchronous>, transform_indices = @transform_7, window_bounds = array<i64: 128, 128>}, {pipeline_mode = #tpu.pipeline_mode<synchronous>, transform_indices = @transform_8, window_bounds = array<i64: 128, 128>}, {pipeline_mode = #tpu.pipeline_mode<synchronous>, transform_indices = @transform_9, window_bounds = array<i64: 1, 128>}, {transform_indices = @transform_10, window_bounds = array<i64: 128, 128>}]} {
    %c0_i32 = arith.constant 0 : i32
    %0 = arith.cmpi eq, %arg0, %c0_i32 : i32
    %c0_i32_0 = arith.constant 0 : i32
    %1 = arith.cmpi eq, %arg1, %c0_i32_0 : i32
    %2 = arith.andi %0, %1 : i1
    %c0_i32_1 = arith.constant 0 : i32
    %3 = arith.cmpi eq, %arg2, %c0_i32_1 : i32
    %4 = arith.andi %2, %3 : i1
    %5 = arith.extui %4 : i1 to i32
    %c0_i32_2 = arith.constant 0 : i32
    %6 = arith.cmpi ne, %5, %c0_i32_2 : i32
    scf.if %6 {
      %cst = arith.constant 0.000000e+00 : f32
      %36 = vector.broadcast %cst : f32 to vector<128x128xf32>
      %c0_19 = arith.constant 0 : index
      %c0_20 = arith.constant 0 : index
      %37 = vector.load %arg13[%c0_19, %c0_20] : memref<128x128xf32, #tpu.memory_space<vmem>>, vector<128x128xf32>
      tpu.vector_store %arg13[%c0_19, %c0_20], %36 {strides = array<i32>} : memref<128x128xf32, #tpu.memory_space<vmem>>, vector<128x128xf32>,
    } else {
    }
    %c0 = arith.constant 0 : index
    %c0_3 = arith.constant 0 : index
    %7 = vector.load %arg3[%c0, %c0_3] : memref<128x128xi8, #tpu.memory_space<vmem>>, vector<128x128xi8>
    %8 = arith.sitofp %7 : vector<128x128xi8> to vector<128x128xf32>
    %9 = arith.truncf %8 : vector<128x128xf32> to vector<128x128xbf16>
    %c0_i32_4 = arith.constant 0 : i32
    %10 = arith.cmpi eq, %arg0, %c0_i32_4 : i32
    %c0_i32_5 = arith.constant 0 : i32
    %11 = arith.cmpi eq, %arg2, %c0_i32_5 : i32
    %12 = arith.andi %10, %11 : i1
    %13 = arith.extui %12 : i1 to i32
    %c0_i32_6 = arith.constant 0 : i32
    %14 = arith.cmpi ne, %13, %c0_i32_6 : i32
    scf.if %14 {
      %cst = arith.constant 0.000000e+00 : f32
      %36 = vector.broadcast %cst : f32 to vector<128x128xf32>
      %c0_19 = arith.constant 0 : index
      %c0_20 = arith.constant 0 : index
      %37 = vector.load %arg14[%c0_19, %c0_20] : memref<128x128xf32, #tpu.memory_space<vmem>>, vector<128x128xf32>
      tpu.vector_store %arg14[%c0_19, %c0_20], %36 {strides = array<i32>} : memref<128x128xf32, #tpu.memory_space<vmem>>, vector<128x128xf32>,
    } else {
    }
    %c0_i32_7 = arith.constant 0 : i32
    %15 = arith.cmpi eq, %arg0, %c0_i32_7 : i32
    %16 = arith.extui %15 : i1 to i32
    %c0_i32_8 = arith.constant 0 : i32
    %17 = arith.cmpi ne, %16, %c0_i32_8 : i32
    scf.if %17 {
      %c0_19 = arith.constant 0 : index
      %c0_20 = arith.constant 0 : index
      %36 = vector.load %arg14[%c0_19, %c0_20] : memref<128x128xf32, #tpu.memory_space<vmem>>, vector<128x128xf32>
      %c0_21 = arith.constant 0 : index
      %c0_22 = arith.constant 0 : index
      %37 = vector.load %arg4[%c0_21, %c0_22] : memref<128x128xbf16, #tpu.memory_space<vmem>>, vector<128x128xbf16>
      %cst = arith.constant dense<0.000000e+00> : vector<128x128xf32>
      %38 = tpu.matmul %9, %37, %cst {dimension_numbers = #tpu.dot_dimension_numbers<[1], [0], [0], [1], [0, 0, 1, 1], [], []>} : vector<128x128xbf16>, vector<128x128xbf16>, vector<128x128xf32> -> vector<128x128xf32>
      %39 = arith.addf %36, %38 : vector<128x128xf32>
      %c0_23 = arith.constant 0 : index
      %c0_24 = arith.constant 0 : index
      %40 = vector.load %arg14[%c0_23, %c0_24] : memref<128x128xf32, #tpu.memory_space<vmem>>, vector<128x128xf32>
      tpu.vector_store %arg14[%c0_23, %c0_24], %39 {strides = array<i32>} : memref<128x128xf32, #tpu.memory_space<vmem>>, vector<128x128xf32>,
    } else {
    }
    %c0_i32_9 = arith.constant 0 : i32
    %18 = arith.cmpi eq, %arg0, %c0_i32_9 : i32
    %c0_i32_10 = arith.constant 0 : i32
    %19 = arith.cmpi eq, %arg2, %c0_i32_10 : i32
    %20 = arith.andi %18, %19 : i1
    %21 = arith.extui %20 : i1 to i32
    %c0_i32_11 = arith.constant 0 : i32
    %22 = arith.cmpi ne, %21, %c0_i32_11 : i32
    scf.if %22 {
      %c0_19 = arith.constant 0 : index
      %c0_20 = arith.constant 0 : index
      %36 = vector.load %arg14[%c0_19, %c0_20] : memref<128x128xf32, #tpu.memory_space<vmem>>, vector<128x128xf32>
      %c0_21 = arith.constant 0 : index
      %c0_22 = arith.constant 0 : index
      %37 = vector.load %arg6[%c0_21, %c0_22] : memref<128x1xf32, #tpu.memory_space<vmem>>, vector<128x1xf32>
      %38 = vector.broadcast %37 : vector<128x1xf32> to vector<128x128xf32>
      %39 = arith.mulf %36, %38 : vector<128x128xf32>
      %40 = arith.truncf %39 : vector<128x128xf32> to vector<128x128xbf16>
      %c0_23 = arith.constant 0 : index
      %c0_24 = arith.constant 0 : index
      %41 = vector.load %arg7[%c0_23, %c0_24] : memref<128x128xbf16, #tpu.memory_space<vmem>>, vector<128x128xbf16>
      %cst = arith.constant dense<0.000000e+00> : vector<128x128xf32>
      %42 = tpu.matmul %40, %41, %cst {dimension_numbers = #tpu.dot_dimension_numbers<[1], [0], [0], [1], [0, 0, 1, 1], [], []>} : vector<128x128xbf16>, vector<128x128xbf16>, vector<128x128xf32> -> vector<128x128xf32>
      %c0_25 = arith.constant 0 : index
      %c0_26 = arith.constant 0 : index
      %43 = vector.load %arg5[%c0_25, %c0_26] : memref<128x128xbf16, #tpu.memory_space<vmem>>, vector<128x128xbf16>
      %c0_27 = arith.constant 0 : index
      %c0_28 = arith.constant 0 : index
      %44 = vector.load %arg8[%c0_27, %c0_28] : memref<128x128xbf16, #tpu.memory_space<vmem>>, vector<128x128xbf16>
      %cst_29 = arith.constant dense<0.000000e+00> : vector<128x128xf32>
      %45 = tpu.matmul %43, %44, %cst_29 {dimension_numbers = #tpu.dot_dimension_numbers<[1], [0], [0], [1], [0, 0, 1, 1], [], []>} : vector<128x128xbf16>, vector<128x128xbf16>, vector<128x128xf32> -> vector<128x128xf32>
      %46 = arith.addf %42, %45 : vector<128x128xf32>
      %c0_30 = arith.constant 0 : index
      %c0_31 = arith.constant 0 : index
      %47 = vector.load %arg9[%c0_30, %c0_31] : memref<1x128xf32, #tpu.memory_space<vmem>>, vector<1x128xf32>
      %48 = vector.broadcast %47 : vector<1x128xf32> to vector<128x128xf32>
      %49 = arith.addf %46, %48 : vector<128x128xf32>
      %cst_32 = arith.constant 0.000000e+00 : f32
      %50 = vector.broadcast %cst_32 : f32 to vector<128x128xf32>
      %51 = arith.maximumf %49, %50 : vector<128x128xf32>
      %c128_i32 = arith.constant 128 : i32
      %52 = arith.muli %arg1, %c128_i32 : i32
      %53 = tpu.assume_multiple %52, 128 : i32
      %54 = arith.truncf %51 : vector<128x128xf32> to vector<128x128xbf16>
      %55 = arith.index_cast %53 : i32 to index
      %c0_33 = arith.constant 0 : index
      %56 = vector.load %arg16[%55, %c0_33] : memref<128x128xbf16, #tpu.memory_space<vmem>>, vector<128x128xbf16>
      tpu.vector_store %arg16[%55, %c0_33], %54 {strides = array<i32>} : memref<128x128xbf16, #tpu.memory_space<vmem>>, vector<128x128xbf16>,
    } else {
    }
    %c1_i32 = arith.constant 1 : i32
    %23 = arith.cmpi eq, %arg0, %c1_i32 : i32
    %c0_i32_12 = arith.constant 0 : i32
    %24 = arith.cmpi eq, %arg2, %c0_i32_12 : i32
    %25 = arith.andi %23, %24 : i1
    %26 = arith.extui %25 : i1 to i32
    %c0_i32_13 = arith.constant 0 : i32
    %27 = arith.cmpi ne, %26, %c0_i32_13 : i32
    scf.if %27 {
      %cst = arith.constant 0.000000e+00 : f32
      %36 = vector.broadcast %cst : f32 to vector<128x128xf32>
      %c0_19 = arith.constant 0 : index
      %c0_20 = arith.constant 0 : index
      %37 = vector.load %arg15[%c0_19, %c0_20] : memref<128x128xf32, #tpu.memory_space<vmem>>, vector<128x128xf32>
      tpu.vector_store %arg15[%c0_19, %c0_20], %36 {strides = array<i32>} : memref<128x128xf32, #tpu.memory_space<vmem>>, vector<128x128xf32>,
    } else {
    }
    %c1_i32_14 = arith.constant 1 : i32
    %28 = arith.cmpi eq, %arg0, %c1_i32_14 : i32
    %29 = arith.extui %28 : i1 to i32
    %c0_i32_15 = arith.constant 0 : i32
    %30 = arith.cmpi ne, %29, %c0_i32_15 : i32
    scf.if %30 {
      %c128_i32 = arith.constant 128 : i32
      %36 = arith.muli %arg2, %c128_i32 : i32
      %37 = tpu.assume_multiple %36, 128 : i32
      %c0_19 = arith.constant 0 : index
      %c0_20 = arith.constant 0 : index
      %38 = vector.load %arg15[%c0_19, %c0_20] : memref<128x128xf32, #tpu.memory_space<vmem>>, vector<128x128xf32>
      %39 = arith.index_cast %37 : i32 to index
      %c0_21 = arith.constant 0 : index
      %40 = vector.load %arg16[%39, %c0_21] : memref<128x128xbf16, #tpu.memory_space<vmem>>, vector<128x128xbf16>
      %cst = arith.constant dense<0.000000e+00> : vector<128x128xf32>
      %41 = tpu.matmul %9, %40, %cst {dimension_numbers = #tpu.dot_dimension_numbers<[1], [0], [0], [1], [0, 0, 1, 1], [], []>} : vector<128x128xbf16>, vector<128x128xbf16>, vector<128x128xf32> -> vector<128x128xf32>
      %42 = arith.addf %38, %41 : vector<128x128xf32>
      %c0_22 = arith.constant 0 : index
      %c0_23 = arith.constant 0 : index
      %43 = vector.load %arg15[%c0_22, %c0_23] : memref<128x128xf32, #tpu.memory_space<vmem>>, vector<128x128xf32>
      tpu.vector_store %arg15[%c0_22, %c0_23], %42 {strides = array<i32>} : memref<128x128xf32, #tpu.memory_space<vmem>>, vector<128x128xf32>,
    } else {
    }
    %c1_i32_16 = arith.constant 1 : i32
    %31 = arith.cmpi eq, %arg0, %c1_i32_16 : i32
    %c0_i32_17 = arith.constant 0 : i32
    %32 = arith.cmpi eq, %arg2, %c0_i32_17 : i32
    %33 = arith.andi %31, %32 : i1
    %34 = arith.extui %33 : i1 to i32
    %c0_i32_18 = arith.constant 0 : i32
    %35 = arith.cmpi ne, %34, %c0_i32_18 : i32
    scf.if %35 {
      %c128_i32 = arith.constant 128 : i32
      %36 = arith.muli %arg1, %c128_i32 : i32
      %37 = tpu.assume_multiple %36, 128 : i32
      %c0_19 = arith.constant 0 : index
      %c0_20 = arith.constant 0 : index
      %38 = vector.load %arg15[%c0_19, %c0_20] : memref<128x128xf32, #tpu.memory_space<vmem>>, vector<128x128xf32>
      %c0_21 = arith.constant 0 : index
      %c0_22 = arith.constant 0 : index
      %39 = vector.load %arg6[%c0_21, %c0_22] : memref<128x1xf32, #tpu.memory_space<vmem>>, vector<128x1xf32>
      %40 = vector.broadcast %39 : vector<128x1xf32> to vector<128x128xf32>
      %41 = arith.mulf %38, %40 : vector<128x128xf32>
      %42 = arith.truncf %41 : vector<128x128xf32> to vector<128x128xbf16>
      %c0_23 = arith.constant 0 : index
      %c0_24 = arith.constant 0 : index
      %43 = vector.load %arg10[%c0_23, %c0_24] : memref<128x128xbf16, #tpu.memory_space<vmem>>, vector<128x128xbf16>
      %cst = arith.constant dense<0.000000e+00> : vector<128x128xf32>
      %44 = tpu.matmul %42, %43, %cst {dimension_numbers = #tpu.dot_dimension_numbers<[1], [0], [0], [1], [0, 0, 1, 1], [], []>} : vector<128x128xbf16>, vector<128x128xbf16>, vector<128x128xf32> -> vector<128x128xf32>
      %45 = arith.index_cast %37 : i32 to index
      %c0_25 = arith.constant 0 : index
      %46 = vector.load %arg16[%45, %c0_25] : memref<128x128xbf16, #tpu.memory_space<vmem>>, vector<128x128xbf16>
      %c0_26 = arith.constant 0 : index
      %c0_27 = arith.constant 0 : index
      %47 = vector.load %arg11[%c0_26, %c0_27] : memref<128x128xbf16, #tpu.memory_space<vmem>>, vector<128x128xbf16>
      %cst_28 = arith.constant dense<0.000000e+00> : vector<128x128xf32>
      %48 = tpu.matmul %46, %47, %cst_28 {dimension_numbers = #tpu.dot_dimension_numbers<[1], [0], [0], [1], [0, 0, 1, 1], [], []>} : vector<128x128xbf16>, vector<128x128xbf16>, vector<128x128xf32> -> vector<128x128xf32>
      %49 = arith.addf %44, %48 : vector<128x128xf32>
      %c0_29 = arith.constant 0 : index
      %c0_30 = arith.constant 0 : index
      %50 = vector.load %arg12[%c0_29, %c0_30] : memref<1x128xf32, #tpu.memory_space<vmem>>, vector<1x128xf32>
      %51 = vector.broadcast %50 : vector<1x128xf32> to vector<128x128xf32>
      %52 = arith.addf %49, %51 : vector<128x128xf32>
      %cst_31 = arith.constant 0.000000e+00 : f32
      %53 = vector.broadcast %cst_31 : f32 to vector<128x128xf32>
      %54 = arith.maximumf %52, %53 : vector<128x128xf32>
      %c0_32 = arith.constant 0 : index
      %c0_33 = arith.constant 0 : index
      %55 = vector.load %arg13[%c0_32, %c0_33] : memref<128x128xf32, #tpu.memory_space<vmem>>, vector<128x128xf32>
      tpu.vector_store %arg13[%c0_32, %c0_33], %54 {strides = array<i32>} : memref<128x128xf32, #tpu.memory_space<vmem>>, vector<128x128xf32>,
    } else {
    }
    return
  }
  func.func @transform_0(%arg0: i32, %arg1: i32, %arg2: i32) -> (i32, i32) {
    %c0_i32 = arith.constant 0 : i32
    return %arg1, %arg2 : i32, i32
  }
  func.func @transform_1(%arg0: i32, %arg1: i32, %arg2: i32) -> (i32, i32) {
    %c1_i32 = arith.constant 1 : i32
    %0 = arith.subi %c1_i32, %arg0 : i32
    %1 = arith.muli %0, %arg2 : i32
    %c0_i32 = arith.constant 0 : i32
    %c0_i32_0 = arith.constant 0 : i32
    return %1, %c0_i32 : i32, i32
  }
  func.func @transform_2(%arg0: i32, %arg1: i32, %arg2: i32) -> (i32, i32) {
    %c1_i32 = arith.constant 1 : i32
    %0 = arith.subi %c1_i32, %arg0 : i32
    %1 = arith.muli %0, %arg1 : i32
    %c0_i32 = arith.constant 0 : i32
    %c0_i32_0 = arith.constant 0 : i32
    return %1, %c0_i32 : i32, i32
  }
  func.func @transform_3(%arg0: i32, %arg1: i32, %arg2: i32) -> (i32, i32) {
    %c0_i32 = arith.constant 0 : i32
    %c0_i32_0 = arith.constant 0 : i32
    return %arg1, %c0_i32 : i32, i32
  }
  func.func @transform_4(%arg0: i32, %arg1: i32, %arg2: i32) -> (i32, i32) {
    %c0_i32 = arith.constant 0 : i32
    %c0_i32_0 = arith.constant 0 : i32
    %c0_i32_1 = arith.constant 0 : i32
    return %c0_i32, %c0_i32_0 : i32, i32
  }
  func.func @transform_5(%arg0: i32, %arg1: i32, %arg2: i32) -> (i32, i32) {
    %c0_i32 = arith.constant 0 : i32
    %c0_i32_0 = arith.constant 0 : i32
    %c0_i32_1 = arith.constant 0 : i32
    return %c0_i32, %c0_i32_0 : i32, i32
  }
  func.func @transform_6(%arg0: i32, %arg1: i32, %arg2: i32) -> (i32, i32) {
    %c0_i32 = arith.constant 0 : i32
    %c0_i32_0 = arith.constant 0 : i32
    %c0_i32_1 = arith.constant 0 : i32
    return %c0_i32, %c0_i32_0 : i32, i32
  }
  func.func @transform_7(%arg0: i32, %arg1: i32, %arg2: i32) -> (i32, i32) {
    %c0_i32 = arith.constant 0 : i32
    %c0_i32_0 = arith.constant 0 : i32
    %c0_i32_1 = arith.constant 0 : i32
    return %c0_i32, %c0_i32_0 : i32, i32
  }
  func.func @transform_8(%arg0: i32, %arg1: i32, %arg2: i32) -> (i32, i32) {
    %c0_i32 = arith.constant 0 : i32
    %c0_i32_0 = arith.constant 0 : i32
    %c0_i32_1 = arith.constant 0 : i32
    return %c0_i32, %c0_i32_0 : i32, i32
  }
  func.func @transform_9(%arg0: i32, %arg1: i32, %arg2: i32) -> (i32, i32) {
    %c0_i32 = arith.constant 0 : i32
    %c0_i32_0 = arith.constant 0 : i32
    %c0_i32_1 = arith.constant 0 : i32
    return %c0_i32, %c0_i32_0 : i32, i32
  }
  func.func @transform_10(%arg0: i32, %arg1: i32, %arg2: i32) -> (i32, i32) {
    %0 = arith.muli %arg1, %arg0 : i32
    %c0_i32 = arith.constant 0 : i32
    %c0_i32_0 = arith.constant 0 : i32
    return %0, %c0_i32 : i32, i32
  }
}

</mosaic_0001>

<bundles_post_ra>
// kernel: gnn_forward.1
= control target key start
LH: loop header
LB: loop body
LE: loop exit
PB: predicated region body
PF: predicated region fallthrough
CT: control target
= control target key end

     0   :  { %s2768_s13 = smov 0   ;;  %s2770_s14 = smov 0   ;;  %s3273_s0 = inlined_call_operand.vmem [shape: s8[128,128], index: 0, kind: input, shape index: {}]   ;;  %s3274_s1 = inlined_call_operand.vmem [shape: bf16[128,128], index: 1, kind: input, shape index: {}, may-alias: {1,2}]   ;;  %s3275_s2 = inlined_call_operand.vmem [shape: bf16[128,128], index: 2, kind: input, shape index: {}, may-alias: {1,2}]   ;;  %s3276_s3 = inlined_call_operand.vmem [shape: f32[128,1], index: 3, kind: input, shape index: {}]   ;;  %s3277_s4 = inlined_call_operand.vmem [shape: bf16[128,128], index: 4, kind: input, shape index: {}]   ;;  %s3278_s5 = inlined_call_operand.vmem [shape: bf16[128,128], index: 5, kind: input, shape index: {}]   ;;  %s3279_s6 = inlined_call_operand.vmem [shape: f32[1,128], index: 6, kind: input, shape index: {}]   ;;  %s3280_s7 = inlined_call_operand.vmem [shape: bf16[128,128], index: 7, kind: input, shape index: {}]   ;;  %s3281_s8 = inlined_call_operand.vmem [shape: bf16[128,128], index: 8, kind: input, shape index: {}]   ;;  %s3282_s9 = inlined_call_operand.vmem [shape: f32[1,128], index: 9, kind: input, shape index: {}]   ;;  %s3283_s10 = inlined_call_operand.vmem [shape: f32[128,128], index: 10, kind: output, shape index: {}]  }
   0x1   :  { %s2772_s15 = smov 0  }
   0x2 LB: > { %s39_s16 = sadd.s32 1, %s2702_s14  ;;  %p2186_p0 = scmp.ge.s32.totalorder %s2706_s15, 1  ;;  %s2706_s15 = sphi %s2772_s15, %s20_s15   ;;  %s2702_s14 = sphi %s2770_s14, %s3285_s14   ;;  %s2698_s13 = sphi %s2768_s13, %s3284_s13  }
   0x3   : > { %p41_p1 = scmp.ge.s32.totalorder %s39_s16, 2  ;;  %p388_p2 = scmp.lt.s32.totalorder %s2706_s15, 3 }
   0x5   : > { %s3287_s16 = smov (%p41_p1, %s39_s16), 0  ;;  %p389_p3 = pnand %p2186_p0, %p388_p2 }
   0x6   : > { %p493_p4 = scmp.eq.s32.totalorder (!%p389_p3), %s2698_s13, 0 }
   0x7   : > { %392 = sbr.rel (%p389_p3) target bundleno = 1334 (0x536), region = 60 }
   0xe   : > { %501 = sbr.rel (!%p493_p4) target bundleno = 23 (0x17), region = 64  ;;  %v2708_v0 = vmov (%p493_p4), 0.0  }
   0xf   : > { %502 = vst [vmem:[%s3283_s10] sm:$0xff] (%p493_p4), %v2708_v0  ;;  %503 = vst [vmem:[%s3283_s10 + $0x8] sm:$0xff] (%p493_p4), %v2708_v0 }
  0x10   : > { %504 = vst [vmem:[%s3283_s10 + $0x10] sm:$0xff] (%p493_p4), %v2708_v0  ;;  %505 = vst [vmem:[%s3283_s10 + $0x18] sm:$0xff] (%p493_p4), %v2708_v0 }
  0x11   : > { %506 = vst [vmem:[%s3283_s10 + $0x20] sm:$0xff] (%p493_p4), %v2708_v0  ;;  %507 = vst [vmem:[%s3283_s10 + $0x28] sm:$0xff] (%p493_p4), %v2708_v0 }
  0x12   : > { %508 = vst [vmem:[%s3283_s10 + $0x30] sm:$0xff] (%p493_p4), %v2708_v0  ;;  %509 = vst [vmem:[%s3283_s10 + $0x38] sm:$0xff] (%p493_p4), %v2708_v0 }
  0x13   : > { %510 = vst [vmem:[%s3283_s10 + $0x40] sm:$0xff] (%p493_p4), %v2708_v0  ;;  %511 = vst [vmem:[%s3283_s10 + $0x48] sm:$0xff] (%p493_p4), %v2708_v0 }
  0x14   : > { %512 = vst [vmem:[%s3283_s10 + $0x50] sm:$0xff] (%p493_p4), %v2708_v0  ;;  %513 = vst [vmem:[%s3283_s10 + $0x58] sm:$0xff] (%p493_p4), %v2708_v0 }
  0x15   : > { %514 = vst [vmem:[%s3283_s10 + $0x60] sm:$0xff] %v2708_v0  ;;  %515 = vst [vmem:[%s3283_s10 + $0x68] sm:$0xff] %v2708_v0 }
  0x16   : > { %516 = vst [vmem:[%s3283_s10 + $0x70] sm:$0xff] %v2708_v0  ;;  %517 = vst [vmem:[%s3283_s10 + $0x78] sm:$0xff] %v2708_v0 }
  0x17 PF: > { %v2842_v1 = vld [vmem:[%s3273_s0] sm:$0xff]  ;;  %v2847_v2 = vld [vmem:[%s3273_s0 + $0x8] sm:$0xff]  ;;  %v2852_v3 = vld [vmem:[%s3273_s0 + $0x10] sm:$0xff]  ;;  %533 = sbr.rel (!%p493_p4) target bundleno = 32 (0x20), region = 68  ;;  %v2709_v13 = vmov (%p493_p4), 0.0  }
  0x18   : > { %v2857_v4 = vld [vmem:[%s3273_s0 + $0x18] sm:$0xff]  ;;  %v522_v5 = vunpack.c.l.s8.bf16 %v2842_v1  ;;  %v523_v6 = vunpack.c.h.s8.bf16 %v2842_v1  ;;  %v524_v7 = vunpack.c.l.s8.bf16 %v2847_v2  ;;  %v525_v8 = vunpack.c.h.s8.bf16 %v2847_v2  ;;  %534 = vst [vmem:[#allocation2] sm:$0xff] (%p493_p4), %v2709_v13  ;;  %535 = vst [vmem:[#allocation2 + $0x8] sm:$0xff] (%p493_p4), %v2709_v13 }
  0x19   : > { %v526_v9 = vunpack.c.l.s8.bf16 %v2852_v3  ;;  %v527_v10 = vunpack.c.h.s8.bf16 %v2852_v3  ;;  %v528_v11 = vunpack.c.l.s8.bf16 %v2857_v4  ;;  %v529_v12 = vunpack.c.h.s8.bf16 %v2857_v4  ;;  %536 = vst [vmem:[#allocation2 + $0x10] sm:$0xff] (%p493_p4), %v2709_v13  ;;  %537 = vst [vmem:[#allocation2 + $0x18] sm:$0xff] (%p493_p4), %v2709_v13 }
  0x1a   : > { %538 = vst [vmem:[#allocation2 + $0x20] sm:$0xff] (%p493_p4), %v2709_v13  ;;  %539 = vst [vmem:[#allocation2 + $0x28] sm:$0xff] (%p493_p4), %v2709_v13 }
  0x1b   : > { %540 = vst [vmem:[#allocation2 + $0x30] sm:$0xff] (%p493_p4), %v2709_v13  ;;  %541 = vst [vmem:[#allocation2 + $0x38] sm:$0xff] (%p493_p4), %v2709_v13 }
  0x1c   : > { %542 = vst [vmem:[#allocation2 + $0x40] sm:$0xff] (%p493_p4), %v2709_v13  ;;  %543 = vst [vmem:[#allocation2 + $0x48] sm:$0xff] (%p493_p4), %v2709_v13 }
  0x1d   : > { %544 = vst [vmem:[#allocation2 + $0x50] sm:$0xff] (%p493_p4), %v2709_v13  ;;  %545 = vst [vmem:[#allocation2 + $0x58] sm:$0xff] (%p493_p4), %v2709_v13 }
  0x1e   : > { %546 = vst [vmem:[#allocation2 + $0x60] sm:$0xff] %v2709_v13  ;;  %547 = vst [vmem:[#allocation2 + $0x68] sm:$0xff] %v2709_v13 }
  0x1f   : > { %548 = vst [vmem:[#allocation2 + $0x70] sm:$0xff] %v2709_v13  ;;  %549 = vst [vmem:[#allocation2 + $0x78] sm:$0xff] %v2709_v13 }
  0x20 PF: > { %p2190_p5 = scmp.ne.s32.totalorder %s2698_s13, 0 }
  0x21   : > { %v2632_v14 = vld [vmem:[%s3274_s1] sm:$0xff] (!%p2190_p5)   ;;  %2363 = vmatprep.mubr.bf16.mxu0 (!%p2190_p5), %v522_v5  ;;  %2371 = vmatprep.mubr.bf16.mxu1 (!%p2190_p5), %v526_v9  ;;  %v2633_v15 = vld [vmem:[%s3274_s1 + $0x8] sm:$0xff] (!%p2190_p5)   ;;  %v2634_v16 = vld [vmem:[%s3274_s1 + $0x10] sm:$0xff] (!%p2190_p5)  }
  0x22   : > { %552 = sbr.rel (%p2190_p5) target bundleno = 292 (0x124), region = 72  ;;  %2347 = vmatprep.subr.bf16.mxu0 (!%p2190_p5), %v2632_v14  ;;  %2539 = vmatprep.subr.bf16.mxu1 (!%p2190_p5), %v2632_v14  ;;  %v2635_v17 = vld [vmem:[%s3274_s1 + $0x18] sm:$0xff] (!%p2190_p5)   ;;  %v2636_v18 = vld [vmem:[%s3274_s1 + $0x20] sm:$0xff] (!%p2190_p5)   ;;  %v2637_v19 = vld [vmem:[%s3274_s1 + $0x28] sm:$0xff] (!%p2190_p5)  }
  0x23   : > { %2348 = vmatpush3.bf16.msra.mxu0 (!%p2190_p5), %v2632_v14  ;;  %2547 = vmatpush3.bf16.msra.mxu1 (!%p2190_p5), %v2632_v14  ;;  %v2638_v20 = vld [vmem:[%s3274_s1 + $0x30] sm:$0xff] (!%p2190_p5)   ;;  %v2639_v21 = vld [vmem:[%s3274_s1 + $0x38] sm:$0xff] (!%p2190_p5)   ;;  %v553_v24 = vld [vmem:[#allocation2] sm:$0xff] (!%p2190_p5) }
  0x24   : > { %2349 = vmatprep.subr.bf16.mxu0 (!%p2190_p5), %v2633_v15  ;;  %2540 = vmatprep.subr.bf16.mxu1 (!%p2190_p5), %v2633_v15  ;;  %v555_v22 = vld [vmem:[#allocation2 + $0x10] sm:$0xff] (!%p2190_p5)  ;;  %v556_v28 = vld [vmem:[#allocation2 + $0x18] sm:$0xff] (!%p2190_p5)  ;;  %v554_v34 = vld [vmem:[#allocation2 + $0x8] sm:$0xff] (!%p2190_p5) }
  0x25   : > { %v561_v25 = vld [vmem:[#allocation2 + $0x40] sm:$0xff] (!%p2190_p5)  ;;  %v562_v35 = vld [vmem:[#allocation2 + $0x48] sm:$0xff] (!%p2190_p5)  ;;  %v559_v46 = vld [vmem:[#allocation2 + $0x30] sm:$0xff] (!%p2190_p5) }
  0x26   : > { %v563_v23 = vld [vmem:[#allocation2 + $0x50] sm:$0xff] (!%p2190_p5)  ;;  %v564_v29 = vld [vmem:[#allocation2 + $0x58] sm:$0xff] (!%p2190_p5)  ;;  %v557_v48 = vld [vmem:[#allocation2 + $0x20] sm:$0xff] (!%p2190_p5) }
  0x27   : > { %2350 = vmatpush3.bf16.msra.mxu0 (!%p2190_p5), %v2633_v15  ;;  %2548 = vmatpush3.bf16.msra.mxu1 (!%p2190_p5), %v2633_v15  ;;  %v567_v47 = vld [vmem:[#allocation2 + $0x70] sm:$0xff] (!%p2190_p5)  ;;  %v565_v49 = vld [vmem:[#allocation2 + $0x60] sm:$0xff] (!%p2190_p5)  ;;  %v560_v52 = vld [vmem:[#allocation2 + $0x38] sm:$0xff] (!%p2190_p5) }
  0x28   : > { %2351 = vmatprep.subr.bf16.mxu0 (!%p2190_p5), %v2634_v16  ;;  %2541 = vmatprep.subr.bf16.mxu1 (!%p2190_p5), %v2634_v16  ;;  %v568_v53 = vld [vmem:[#allocation2 + $0x78] sm:$0xff] (!%p2190_p5)  ;;  %v558_v58 = vld [vmem:[#allocation2 + $0x28] sm:$0xff] (!%p2190_p5) }
  0x29   : > { %v566_v59 = vld [vmem:[#allocation2 + $0x68] sm:$0xff] }
  0x2b   : > { %2352 = vmatpush3.bf16.msra.mxu0 %v2634_v16  ;;  %2549 = vmatpush3.bf16.msra.mxu1 %v2634_v16 }
  0x2c   : > { %2353 = vmatprep.subr.bf16.mxu0 %v2635_v17  ;;  %2542 = vmatprep.subr.bf16.mxu1 %v2635_v17 }
  0x2f   : > { %2354 = vmatpush3.bf16.msra.mxu0 %v2635_v17  ;;  %2550 = vmatpush3.bf16.msra.mxu1 %v2635_v17 }
  0x30   : > { %2355 = vmatprep.subr.bf16.mxu0 %v2636_v18  ;;  %2543 = vmatprep.subr.bf16.mxu1 %v2636_v18 }
  0x33   : > { %2356 = vmatpush3.bf16.msra.mxu0 %v2636_v18  ;;  %2551 = vmatpush3.bf16.msra.mxu1 %v2636_v18 }
  0x34   : > { %2357 = vmatprep.subr.bf16.mxu0 %v2637_v19  ;;  %2544 = vmatprep.subr.bf16.mxu1 %v2637_v19 }
  0x37   : > { %2358 = vmatpush3.bf16.msra.mxu0 %v2637_v19  ;;  %2552 = vmatpush3.bf16.msra.mxu1 %v2637_v19 }
  0x38   : > { %2359 = vmatprep.subr.bf16.mxu0 %v2638_v20  ;;  %2545 = vmatprep.subr.bf16.mxu1 %v2638_v20 }
  0x3b   : > { %2360 = vmatpush3.bf16.msra.mxu0 %v2638_v20  ;;  %2553 = vmatpush3.bf16.msra.mxu1 %v2638_v20 }
  0x3c   : > { %2361 = vmatprep.subr.bf16.mxu0 %v2639_v21  ;;  %2546 = vmatprep.subr.bf16.mxu1 %v2639_v21 }
  0x3f   : > { %2362 = vmatpush3.bf16.msra.mxu0 %v2639_v21  ;;  %2554 = vmatpush3.bf16.msra.mxu1 %v2639_v21 }
  0x42   : > { %2364 = vmatmul.mubr.bf16.vlgmr.msra.gmra.mrb[0].mxu0 %v523_v6  ;;  %2372 = vmatmul.mubr.bf16.vlgmr.msra.gmra.mrb[0].mxu1 %v527_v10 }
  0x43   : > { %2367 = vmatprep.mubr.bf16.mxu0 %v524_v7  ;;  %2375 = vmatprep.mubr.bf16.mxu1 %v528_v11 }
  0x4a   : > { %2368 = vmatmul.mubr.bf16.gmra.mrb[4].mxu0 %v525_v8  ;;  %2376 = vmatmul.mubr.bf16.gmra.mrb[4].mxu1 %v529_v12 }
 0x115   : > { %v2365_v26 = vpop.f32.mrb[0].mxu0  ;;  %v2373_v27 = vpop.f32.mrb[0].mxu1 }
 0x116   : > { %v732_v30 = vadd.f32 %v2365_v26, %v555_v22  ;;  %v740_v31 = vadd.f32 %v2373_v27, %v563_v23  ;;  %v667_v32 = vpop.f32.mrb[1].mxu0  ;;  %v699_v33 = vpop.f32.mrb[1].mxu1 }
 0x117   : > { %v730_v36 = vadd.f32 %v667_v32, %v553_v24  ;;  %v738_v37 = vadd.f32 %v699_v33, %v561_v25  ;;  %v2366_v38 = vpop.f32.mrb[2].mxu0  ;;  %v2374_v39 = vpop.f32.mrb[2].mxu1 }
 0x118   : > { %748 = vst [vmem:[#allocation2 + $0x10] sm:$0xff] %v732_v30  ;;  %756 = vst [vmem:[#allocation2 + $0x50] sm:$0xff] %v740_v31  ;;  %v733_v40 = vadd.f32 %v2366_v38, %v556_v28  ;;  %v741_v41 = vadd.f32 %v2374_v39, %v564_v29  ;;  %v670_v42 = vpop.f32.mrb[3].mxu0  ;;  %v702_v43 = vpop.f32.mrb[3].mxu1 }
 0x119   : > { %746 = vst [vmem:[#allocation2] sm:$0xff] %v730_v36  ;;  %754 = vst [vmem:[#allocation2 + $0x40] sm:$0xff] %v738_v37  ;;  %v731_v44 = vadd.f32 %v670_v42, %v554_v34  ;;  %v739_v45 = vadd.f32 %v702_v43, %v562_v35 }
 0x11a   : > { %749 = vst [vmem:[#allocation2 + $0x18] sm:$0xff] %v733_v40  ;;  %757 = vst [vmem:[#allocation2 + $0x58] sm:$0xff] %v741_v41 }
 0x11b   : > { %747 = vst [vmem:[#allocation2 + $0x8] sm:$0xff] %v731_v44  ;;  %755 = vst [vmem:[#allocation2 + $0x48] sm:$0xff] %v739_v45 }
 0x11d   : > { %v2369_v50 = vpop.f32.mrb[4].mxu0  ;;  %v2377_v51 = vpop.f32.mrb[4].mxu1 }
 0x11e   : > { %v736_v54 = vadd.f32 %v2369_v50, %v559_v46  ;;  %v744_v55 = vadd.f32 %v2377_v51, %v567_v47  ;;  %v683_v56 = vpop.f32.mrb[5].mxu0  ;;  %v715_v57 = vpop.f32.mrb[5].mxu1 }
 0x11f   : > { %v734_v60 = vadd.f32 %v683_v56, %v557_v48  ;;  %v742_v61 = vadd.f32 %v715_v57, %v565_v49  ;;  %v2370_v62 = vpop.f32.mrb[6].mxu0  ;;  %v2378_v63 = vpop.f32.mrb[6].mxu1 }
 0x120   : > { %752 = vst [vmem:[#allocation2 + $0x30] sm:$0xff] %v736_v54  ;;  %760 = vst [vmem:[#allocation2 + $0x70] sm:$0xff] %v744_v55  ;;  %v737_v0 = vadd.f32 %v2370_v62, %v560_v52  ;;  %v745_v13 = vadd.f32 %v2378_v63, %v568_v53  ;;  %v686_v14 = vpop.f32.mrb[7].mxu0  ;;  %v718_v15 = vpop.f32.mrb[7].mxu1 }
 0x121   : > { %750 = vst [vmem:[#allocation2 + $0x20] sm:$0xff] %v734_v60  ;;  %758 = vst [vmem:[#allocation2 + $0x60] sm:$0xff] %v742_v61  ;;  %v735_v16 = vadd.f32 %v686_v14, %v558_v58  ;;  %v743_v17 = vadd.f32 %v718_v15, %v566_v59 }
 0x122   : > { %753 = vst [vmem:[#allocation2 + $0x38] sm:$0xff] %v737_v0  ;;  %761 = vst [vmem:[#allocation2 + $0x78] sm:$0xff] %v745_v13 }
 0x123   : > { %751 = vst [vmem:[#allocation2 + $0x28] sm:$0xff] %v735_v16  ;;  %759 = vst [vmem:[#allocation2 + $0x68] sm:$0xff] %v743_v17 }
 0x124 PF: > { %763 = sbr.rel (!%p493_p4) target bundleno = 679 (0x2a7), region = 76  ;;  %v782_v18 = vld [vmem:[%s3276_s3 + $0x10] sm:$0xff] (%p493_p4)  ;;  %v780_v19 = vld [vmem:[%s3276_s3] sm:$0xff] (%p493_p4)  ;;  %v2710_v20 = vmov (%p493_p4), 0   ;;  %v783_v21 = vld [vmem:[%s3276_s3 + $0x18] sm:$0xff] (%p493_p4) }
 0x125   : > { %2641 = vset.pattern.permute.xlu1 (%p493_p4), %v2710_v20  ;;  %2640 = vset.pattern.permute.xlu0 (%p493_p4), %v2710_v20  ;;  %v781_v22 = vld [vmem:[%s3276_s3 + $0x8] sm:$0xff] (%p493_p4)  ;;  %v784_v24 = vld [vmem:[%s3276_s3 + $0x20] sm:$0xff] (%p493_p4)  ;;  %v787_v28 = vld [vmem:[%s3276_s3 + $0x38] sm:$0xff] (%p493_p4) }
 0x126   : > { %808 = vperm.xlu1 (%p493_p4), %2641, %v782_v18   ;;  %798 = vperm.xlu0 (%p493_p4), %2640, %v780_v19   ;;  %v785_v23 = vld [vmem:[%s3276_s3 + $0x28] sm:$0xff] (%p493_p4)  ;;  %v2642_v25 = vld [vmem:[%s3278_s5] sm:$0xff] (%p493_p4)   ;;  %v786_v30 = vld [vmem:[%s3276_s3 + $0x30] sm:$0xff] (%p493_p4) }
 0x127   : > { %v2643_v26 = vld [vmem:[%s3277_s4] sm:$0xff] (%p493_p4)   ;;  %2379 = vmatprep.subr.bf16.mxu1 (%p493_p4), %v2642_v25  ;;  %v2644_v27 = vld [vmem:[%s3278_s5 + $0x8] sm:$0xff] (%p493_p4)   ;;  %v2646_v31 = vld [vmem:[%s3278_s5 + $0x10] sm:$0xff] (%p493_p4)  }
 0x128   : > { %2380 = vmatpush3.bf16.msra.mxu1 (%p493_p4), %v2642_v25  ;;  %2411 = vmatprep.subr.bf16.mxu0 (%p493_p4), %v2643_v26  ;;  %v2645_v29 = vld [vmem:[%s3277_s4 + $0x8] sm:$0xff] (%p493_p4)   ;;  %v2647_v32 = vld [vmem:[%s3277_s4 + $0x10] sm:$0xff] (%p493_p4)   ;;  %v788_v34 = vld [vmem:[%s3276_s3 + $0x40] sm:$0xff] (%p493_p4) }
 0x129   : > { %2381 = vmatprep.subr.bf16.mxu1 (%p493_p4), %v2644_v27  ;;  %2412 = vmatpush3.bf16.msra.mxu0 (%p493_p4), %v2643_v26  ;;  %v789_v33 = vld [vmem:[%s3276_s3 + $0x48] sm:$0xff] (%p493_p4)  ;;  %v2648_v35 = vld [vmem:[%s3278_s5 + $0x18] sm:$0xff] (%p493_p4)   ;;  %v790_v38 = vld [vmem:[%s3276_s3 + $0x50] sm:$0xff] (%p493_p4) }
 0x12a   : > { %813 = vperm.xlu1 (%p493_p4), %2641, %v783_v21   ;;  %803 = vperm.xlu0 (%p493_p4), %2640, %v781_v22   ;;  %v2649_v36 = vld [vmem:[%s3277_s4 + $0x18] sm:$0xff] (%p493_p4)   ;;  %v2650_v39 = vld [vmem:[%s3278_s5 + $0x20] sm:$0xff] (%p493_p4)   ;;  %v793_v41 = vld [vmem:[%s3276_s3 + $0x68] sm:$0xff] (%p493_p4) }
 0x12b   : > { %2413 = vmatprep.subr.bf16.mxu0 %v2645_v29  ;;  %v791_v37 = vld [vmem:[%s3276_s3 + $0x58] sm:$0xff]  ;;  %v2651_v40 = vld [vmem:[%s3277_s4 + $0x20] sm:$0xff]   ;;  %v2652_v44 = vld [vmem:[%s3278_s5 + $0x28] sm:$0xff]  }
 0x12c   : > { %2382 = vmatpush3.bf16.msra.mxu1 %v2644_v27  ;;  %v792_v42 = vld [vmem:[%s3276_s3 + $0x60] sm:$0xff]  ;;  %v2653_v45 = vld [vmem:[%s3277_s4 + $0x28] sm:$0xff]   ;;  %v795_v46 = vld [vmem:[%s3276_s3 + $0x78] sm:$0xff] }
 0x12d   : > { %2383 = vmatprep.subr.bf16.mxu1 %v2646_v31  ;;  %2414 = vmatpush3.bf16.msra.mxu0 %v2645_v29  ;;  %v2657_v43 = vld [vmem:[%s3275_s2] sm:$0xff]   ;;  %v794_v47 = vld [vmem:[%s3276_s3 + $0x70] sm:$0xff]  ;;  %v2656_v50 = vld [vmem:[%s3278_s5 + $0x38] sm:$0xff]  }
 0x12e   : > { %823 = vperm.xlu1 %2641, %v785_v23   ;;  %818 = vperm.xlu0 %2640, %v784_v24   ;;  %v2654_v48 = vld [vmem:[%s3278_s5 + $0x30] sm:$0xff]   ;;  %v2658_v51 = vld [vmem:[%s3277_s4 + $0x38] sm:$0xff]   ;;  %v2659_v52 = vld [vmem:[%s3275_s2 + $0x8] sm:$0xff]  }
 0x12f   : > { %2415 = vmatprep.subr.bf16.mxu0 %v2647_v32  ;;  %2395 = vmatprep.mubr.bf16.mxu1 %v2657_v43  ;;  %v2655_v49 = vld [vmem:[%s3277_s4 + $0x30] sm:$0xff]   ;;  %v2661_v54 = vld [vmem:[%s3275_s2 + $0x18] sm:$0xff]   ;;  %v2662_v55 = vld [vmem:[%s3275_s2 + $0x20] sm:$0xff]  }
 0x130   : > { %2384 = vmatpush3.bf16.msra.mxu1 %v2646_v31  ;;  %v2660_v53 = vld [vmem:[%s3275_s2 + $0x10] sm:$0xff]   ;;  %v2663_v56 = vld [vmem:[%s3275_s2 + $0x28] sm:$0xff]   ;;  %v2665_v58 = vld [vmem:[%s3275_s2 + $0x38] sm:$0xff]  }
 0x131   : > { %2385 = vmatprep.subr.bf16.mxu1 %v2648_v35  ;;  %2416 = vmatpush3.bf16.msra.mxu0 %v2647_v32  ;;  %v2664_v57 = vld [vmem:[%s3275_s2 + $0x30] sm:$0xff]   ;;  %v764_v62 = vld [vmem:[#allocation2] sm:$0xff]  ;;  %v767_v63 = vld [vmem:[#allocation2 + $0x18] sm:$0xff] }
 0x132   : > { %833 = vperm.xlu1 %2641, %v787_v28   ;;  %828 = vperm.xlu0 %2640, %v786_v30   ;;  %v766_v61 = vld [vmem:[#allocation2 + $0x10] sm:$0xff]  ;;  %v765_v0 = vld [vmem:[#allocation2 + $0x8] sm:$0xff]  ;;  %v768_v20 = vld [vmem:[#allocation2 + $0x20] sm:$0xff] }
 0x133   : > { %2417 = vmatprep.subr.bf16.mxu0 %v2649_v36  ;;  %v769_v19 = vld [vmem:[#allocation2 + $0x28] sm:$0xff]  ;;  %v771_v27 = vld [vmem:[#allocation2 + $0x38] sm:$0xff]  ;;  %v770_v28 = vld [vmem:[#allocation2 + $0x30] sm:$0xff] }
 0x134   : > { %2386 = vmatpush3.bf16.msra.mxu1 %v2648_v35  ;;  %v772_v35 = vld [vmem:[#allocation2 + $0x40] sm:$0xff] }
 0x135   : > { %2387 = vmatprep.subr.bf16.mxu1 %v2650_v39  ;;  %2418 = vmatpush3.bf16.msra.mxu0 %v2649_v36 }
 0x136   : > { %843 = vperm.xlu1 %2641, %v789_v33   ;;  %838 = vperm.xlu0 %2640, %v788_v34   ;;  %v773_v34 = vld [vmem:[#allocation2 + $0x48] sm:$0xff] }
 0x137   : > { %2419 = vmatprep.subr.bf16.mxu0 %v2651_v40 }
 0x138   : > { %2388 = vmatpush3.bf16.msra.mxu1 %v2650_v39 }
 0x139   : > { %2389 = vmatprep.subr.bf16.mxu1 %v2652_v44  ;;  %2420 = vmatpush3.bf16.msra.mxu0 %v2651_v40 }
 0x13a   : > { %853 = vperm.xlu1 %2641, %v791_v37   ;;  %848 = vperm.xlu0 %2640, %v790_v38  }
 0x13b   : > { %2421 = vmatprep.subr.bf16.mxu0 %v2653_v45 }
 0x13c   : > { %2390 = vmatpush3.bf16.msra.mxu1 %v2652_v44 }
 0x13d   : > { %2391 = vmatprep.subr.bf16.mxu1 %v2654_v48  ;;  %2422 = vmatpush3.bf16.msra.mxu0 %v2653_v45 }
 0x13e   : > { %863 = vperm.xlu1 %2641, %v793_v41   ;;  %858 = vperm.xlu0 %2640, %v792_v42   ;;  %v775_v41 = vld [vmem:[#allocation2 + $0x58] sm:$0xff]  ;;  %v774_v42 = vld [vmem:[#allocation2 + $0x50] sm:$0xff] }
 0x13f   : > { %2423 = vmatprep.subr.bf16.mxu0 %v2655_v49 }
 0x140   : > { %2392 = vmatpush3.bf16.msra.mxu1 %v2654_v48  ;;  %v777_v48 = vld [vmem:[#allocation2 + $0x68] sm:$0xff] }
 0x141   : > { %2393 = vmatprep.subr.bf16.mxu1 %v2656_v50  ;;  %2424 = vmatpush3.bf16.msra.mxu0 %v2655_v49  ;;  %v776_v49 = vld [vmem:[#allocation2 + $0x60] sm:$0xff] }
 0x142   : > { %873 = vperm.xlu1 %2641, %v795_v46   ;;  %868 = vperm.xlu0 %2640, %v794_v47  }
 0x143   : > { %2425 = vmatprep.subr.bf16.mxu0 %v2658_v51 }
 0x144   : > { %2394 = vmatpush3.bf16.msra.mxu1 %v2656_v50 }
 0x145   : > { %2426 = vmatpush3.bf16.msra.mxu0 %v2658_v51 }
 0x147   : > { %2396 = vmatmul.mubr.bf16.vlgmr.msra.gmra.mrb[0].mxu1 %v2659_v52 }
 0x148   : > { %2399 = vmatprep.mubr.bf16.mxu1 %v2660_v53 }
 0x14f   : > { %2400 = vmatmul.mubr.bf16.gmra.mrb[4].mxu1 %v2661_v54 }
 0x150   : > { %2403 = vmatprep.mubr.bf16.mxu1 %v2662_v55  ;;  %v779_v55 = vld [vmem:[#allocation2 + $0x78] sm:$0xff] }
 0x157   : > { %2404 = vmatmul.mubr.bf16.gmra.mrb[8].mxu1 %v2663_v56  ;;  %v778_v56 = vld [vmem:[#allocation2 + $0x70] sm:$0xff] }
 0x158   : > { %2407 = vmatprep.mubr.bf16.mxu1 %v2664_v57 }
 0x15f   : > { %2408 = vmatmul.mubr.bf16.gmra.mrb[12].mxu1 %v2665_v58 }
 0x1a5   : > { %v809_v59 = vpop.permute.xlu1 %808  ;;  %v799_v60 = vpop.permute.xlu0 %798 }
 0x1a6   : > { %v878_v15 = vmul.f32 %v809_v59, %v766_v61  ;;  %v876_v16 = vmul.f32 %v799_v60, %v764_v62 }
 0x1a9   : > { %v814_v13 = vpop.permute.xlu1 %813  ;;  %v804_v14 = vpop.permute.xlu0 %803 }
 0x1aa   : > { %v879_v17 = vmul.f32 %v814_v13, %v767_v63  ;;  %v877_v18 = vmul.f32 %v804_v14, %v765_v0 }
 0x1ac   : > { %v893_v21 = vpack.c.bf16 %v879_v17, %v878_v15  ;;  %v892_v22 = vpack.c.bf16 %v877_v18, %v876_v16 }
 0x1ad   : > { %v824_v23 = vpop.permute.xlu1 %823  ;;  %v819_v24 = vpop.permute.xlu0 %818 }
 0x1ae   : > { %v881_v25 = vmul.f32 %v824_v23, %v769_v19  ;;  %v880_v26 = vmul.f32 %v819_v24, %v768_v20  ;;  %2427 = vmatprep.mubr.bf16.mxu0 %v892_v22 }
 0x1af   : > { %2428 = vmatmul.mubr.bf16.vlgmr.msra.gmra.mrb[0].mxu0 %v893_v21 }
 0x1b0   : > { %v894_v29 = vpack.c.bf16 %v881_v25, %v880_v26 }
 0x1b1   : > { %v834_v30 = vpop.permute.xlu1 %833  ;;  %v829_v31 = vpop.permute.xlu0 %828 }
 0x1b2   : > { %v883_v32 = vmul.f32 %v834_v30, %v771_v27  ;;  %v882_v33 = vmul.f32 %v829_v31, %v770_v28  ;;  %2431 = vmatprep.mubr.bf16.mxu0 %v894_v29  ;;  %v3043_v28 = vld [vmem:[%s3279_s6] ss:$0 sm:$0xff] }
 0x1b4   : > { %v895_v36 = vpack.c.bf16 %v883_v32, %v882_v33 }
 0x1b5   : > { %v844_v37 = vpop.permute.xlu1 %843  ;;  %v839_v38 = vpop.permute.xlu0 %838 }
 0x1b6   : > { %v885_v39 = vmul.f32 %v844_v37, %v773_v34  ;;  %v884_v40 = vmul.f32 %v839_v38, %v772_v35 }
 0x1b7   : > { %2432 = vmatmul.mubr.bf16.gmra.mrb[4].mxu0 %v895_v36 }
 0x1b8   : > { %v896_v43 = vpack.c.bf16 %v885_v39, %v884_v40 }
 0x1b9   : > { %v854_v44 = vpop.permute.xlu1 %853  ;;  %v849_v45 = vpop.permute.xlu0 %848 }
 0x1ba   : > { %v887_v46 = vmul.f32 %v854_v44, %v775_v41  ;;  %v886_v47 = vmul.f32 %v849_v45, %v774_v42  ;;  %2435 = vmatprep.mubr.bf16.mxu0 %v896_v43 }
 0x1bc   : > { %v897_v50 = vpack.c.bf16 %v887_v46, %v886_v47 }
 0x1bd   : > { %v864_v51 = vpop.permute.xlu1 %863  ;;  %v859_v52 = vpop.permute.xlu0 %858 }
 0x1be   : > { %v889_v53 = vmul.f32 %v864_v51, %v777_v48  ;;  %v888_v54 = vmul.f32 %v859_v52, %v776_v49 }
 0x1bf   : > { %2436 = vmatmul.mubr.bf16.gmra.mrb[8].mxu0 %v897_v50 }
 0x1c0   : > { %v898_v57 = vpack.c.bf16 %v889_v53, %v888_v54 }
 0x1c1   : > { %v874_v58 = vpop.permute.xlu1 %873  ;;  %v869_v59 = vpop.permute.xlu0 %868 }
 0x1c2   : > { %v891_v60 = vmul.f32 %v874_v58, %v779_v55  ;;  %v890_v61 = vmul.f32 %v869_v59, %v778_v56  ;;  %2439 = vmatprep.mubr.bf16.mxu0 %v898_v57 }
 0x1c4   : > { %v899_v62 = vpack.c.bf16 %v891_v60, %v890_v61 }
 0x1c7   : > { %2440 = vmatmul.mubr.bf16.gmra.mrb[12].mxu0 %v899_v62 }
 0x21a   : > { %v2397_v63 = vpop.f32.mrb[0].mxu1 }
 0x21b   : > { %v1078_v0 = vpop.f32.mrb[1].mxu1 }
 0x21c   : > { %v2398_v13 = vpop.f32.mrb[2].mxu1 }
 0x21d   : > { %v1081_v14 = vpop.f32.mrb[3].mxu1 }
 0x222   : > { %v2401_v15 = vpop.f32.mrb[4].mxu1 }
 0x223   : > { %v1094_v16 = vpop.f32.mrb[5].mxu1 }
 0x224   : > { %v2402_v17 = vpop.f32.mrb[6].mxu1 }
 0x225   : > { %v1097_v18 = vpop.f32.mrb[7].mxu1 }
 0x22a   : > { %v2405_v19 = vpop.f32.mrb[8].mxu1 }
 0x22b   : > { %v1110_v20 = vpop.f32.mrb[9].mxu1 }
 0x22c   : > { %v2406_v21 = vpop.f32.mrb[10].mxu1 }
 0x22d   : > { %v1113_v22 = vpop.f32.mrb[11].mxu1 }
 0x232   : > { %v3032_v23 = vpop.f32.mrb[12].mxu1 }
 0x233   : > { %v3034_v24 = vpop.f32.mrb[13].mxu1 }
 0x234   : > { %v3036_v25 = vpop.f32.mrb[14].mxu1 }
 0x235   : > { %v3038_v26 = vpop.f32.mrb[15].mxu1 }
 0x282   : > { %v2429_v27 = vpop.f32.mrb[0].mxu0 }
 0x283   : > { %v1232_v29 = vadd.f32 %v2429_v27, %v2397_v63  ;;  %v1223_v30 = vpop.f32.mrb[1].mxu0 }
 0x284   : > { %v1224_v31 = vadd.f32 %v1223_v30, %v1078_v0  ;;  %v2430_v32 = vpop.f32.mrb[2].mxu0 }
 0x285   : > { %v1295_v33 = vadd.f32 %v3043_v28, %v1232_v29  ;;  %v1235_v34 = vadd.f32 %v2430_v32, %v2398_v13  ;;  %v1226_v35 = vpop.f32.mrb[3].mxu0 }
 0x286   : > { %v1293_v36 = vadd.f32 %v3043_v28, %v1224_v31  ;;  %v1227_v37 = vadd.f32 %v1226_v35, %v1081_v14 }
 0x287   : > { %v1296_v38 = vadd.f32 %v3043_v28, %v1235_v34  ;;  %v1311_v40 = vmax.f32 %v1295_v33, 0.0 }
 0x288   : > { %v1294_v39 = vadd.f32 %v3043_v28, %v1227_v37  ;;  %v1309_v42 = vmax.f32 %v1293_v36, 0.0 }
 0x289   : > { %v1312_v41 = vmax.f32 %v1296_v38, 0.0 }
 0x28a   : > { %v1310_v43 = vmax.f32 %v1294_v39, 0.0  ;;  %v2433_v44 = vpop.f32.mrb[4].mxu0 }
 0x28b   : > { %v1327_v45 = vpack.c.bf16 %v1312_v41, %v1311_v40  ;;  %v1248_v46 = vadd.f32 %v2433_v44, %v2401_v15  ;;  %v1239_v47 = vpop.f32.mrb[5].mxu0 }
 0x28c   : > { %v1326_v48 = vpack.c.bf16 %v1310_v43, %v1309_v42  ;;  %v1240_v49 = vadd.f32 %v1239_v47, %v1094_v16  ;;  %v2434_v50 = vpop.f32.mrb[6].mxu0 }
 0x28d   : > { %1339 = vst [vmem:[#allocation4 + $0x8] sm:$0xff] %v1327_v45  ;;  %v1299_v51 = vadd.f32 %v3043_v28, %v1248_v46  ;;  %v1251_v52 = vadd.f32 %v2434_v50, %v2402_v17  ;;  %v1242_v53 = vpop.f32.mrb[7].mxu0 }
 0x28e   : > { %1338 = vst [vmem:[#allocation4] sm:$0xff] %v1326_v48  ;;  %v1297_v54 = vadd.f32 %v3043_v28, %v1240_v49  ;;  %v1243_v55 = vadd.f32 %v1242_v53, %v1097_v18 }
 0x28f   : > { %v1300_v56 = vadd.f32 %v3043_v28, %v1251_v52  ;;  %v1315_v58 = vmax.f32 %v1299_v51, 0.0 }
 0x290   : > { %v1298_v57 = vadd.f32 %v3043_v28, %v1243_v55  ;;  %v1313_v60 = vmax.f32 %v1297_v54, 0.0 }
 0x291   : > { %v1316_v59 = vmax.f32 %v1300_v56, 0.0 }
 0x292   : > { %v1314_v61 = vmax.f32 %v1298_v57, 0.0  ;;  %v2437_v62 = vpop.f32.mrb[8].mxu0 }
 0x293   : > { %v1329_v63 = vpack.c.bf16 %v1316_v59, %v1315_v58  ;;  %v1264_v0 = vadd.f32 %v2437_v62, %v2405_v19  ;;  %v1255_v13 = vpop.f32.mrb[9].mxu0 }
 0x294   : > { %v1328_v14 = vpack.c.bf16 %v1314_v61, %v1313_v60  ;;  %v1256_v15 = vadd.f32 %v1255_v13, %v1110_v20  ;;  %v2438_v16 = vpop.f32.mrb[10].mxu0 }
 0x295   : > { %1341 = vst [vmem:[#allocation4 + $0x18] sm:$0xff] %v1329_v63  ;;  %v1303_v17 = vadd.f32 %v3043_v28, %v1264_v0  ;;  %v1267_v27 = vadd.f32 %v2438_v16, %v2406_v21  ;;  %v1258_v18 = vpop.f32.mrb[11].mxu0 }
 0x296   : > { %1340 = vst [vmem:[#allocation4 + $0x10] sm:$0xff] %v1328_v14  ;;  %v1301_v29 = vadd.f32 %v3043_v28, %v1256_v15  ;;  %v1259_v30 = vadd.f32 %v1258_v18, %v1113_v22 }
 0x297   : > { %v1304_v31 = vadd.f32 %v3043_v28, %v1267_v27  ;;  %v1319_v33 = vmax.f32 %v1303_v17, 0.0 }
 0x298   : > { %v1302_v32 = vadd.f32 %v3043_v28, %v1259_v30  ;;  %v1317_v19 = vmax.f32 %v1301_v29, 0.0 }
 0x299   : > { %v1320_v34 = vmax.f32 %v1304_v31, 0.0 }
 0x29a   : > { %v1318_v35 = vmax.f32 %v1302_v32, 0.0  ;;  %v2441_v36 = vpop.f32.mrb[12].mxu0 }
 0x29b   : > { %v1331_v20 = vpack.c.bf16 %v1320_v34, %v1319_v33  ;;  %v1280_v37 = vadd.f32 %v2441_v36, %v3032_v23  ;;  %v1271_v38 = vpop.f32.mrb[13].mxu0 }
 0x29c   : > { %v1330_v39 = vpack.c.bf16 %v1318_v35, %v1317_v19  ;;  %v1272_v21 = vadd.f32 %v1271_v38, %v3034_v24  ;;  %v2442_v40 = vpop.f32.mrb[14].mxu0 }
 0x29d   : > { %1343 = vst [vmem:[#allocation4 + $0x28] sm:$0xff] %v1331_v20  ;;  %v1307_v22 = vadd.f32 %v3043_v28, %v1280_v37  ;;  %v1283_v41 = vadd.f32 %v2442_v40, %v3036_v25  ;;  %v1274_v42 = vpop.f32.mrb[15].mxu0 }
 0x29e   : > { %1342 = vst [vmem:[#allocation4 + $0x20] sm:$0xff] %v1330_v39  ;;  %v1305_v43 = vadd.f32 %v3043_v28, %v1272_v21  ;;  %v1275_v44 = vadd.f32 %v1274_v42, %v3038_v26 }
 0x29f   : > { %v1308_v45 = vadd.f32 %v3043_v28, %v1283_v41  ;;  %v1323_v46 = vmax.f32 %v1307_v22, 0.0 }
 0x2a0   : > { %v1306_v23 = vadd.f32 %v3043_v28, %v1275_v44  ;;  %v1321_v48 = vmax.f32 %v1305_v43, 0.0 }
 0x2a1   : > { %v1324_v47 = vmax.f32 %v1308_v45, 0.0 }
 0x2a2   : > { %v1322_v24 = vmax.f32 %v1306_v23, 0.0 }
 0x2a3   : > { %v1333_v49 = vpack.c.bf16 %v1324_v47, %v1323_v46 }
 0x2a4   : > { %v1332_v50 = vpack.c.bf16 %v1322_v24, %v1321_v48 }
 0x2a5   : > { %1345 = vst [vmem:[#allocation4 + $0x38] sm:$0xff] %v1333_v49 }
 0x2a6   : > { %1344 = vst [vmem:[#allocation4 + $0x30] sm:$0xff] %v1332_v50 }
 0x2a7 PF: > { %p1346_p6 = scmp.eq.s32.totalorder %s2698_s13, 1 }
 0x2a8   : > { %v2711_v25 = vmov (%p1346_p6), 0.0  }
 0x2a9   : > { %1350 = sbr.rel (!%p1346_p6) target bundleno = 689 (0x2b1), region = 80  ;;  %1351 = vst [vmem:[#allocation3] sm:$0xff] (%p1346_p6), %v2711_v25  ;;  %1352 = vst [vmem:[#allocation3 + $0x8] sm:$0xff] (%p1346_p6), %v2711_v25 }
 0x2aa   : > { %1353 = vst [vmem:[#allocation3 + $0x10] sm:$0xff] (%p1346_p6), %v2711_v25  ;;  %1354 = vst [vmem:[#allocation3 + $0x18] sm:$0xff] (%p1346_p6), %v2711_v25 }
 0x2ab   : > { %1355 = vst [vmem:[#allocation3 + $0x20] sm:$0xff] (%p1346_p6), %v2711_v25  ;;  %1356 = vst [vmem:[#allocation3 + $0x28] sm:$0xff] (%p1346_p6), %v2711_v25 }
 0x2ac   : > { %1357 = vst [vmem:[#allocation3 + $0x30] sm:$0xff] (%p1346_p6), %v2711_v25  ;;  %1358 = vst [vmem:[#allocation3 + $0x38] sm:$0xff] (%p1346_p6), %v2711_v25 }
 0x2ad   : > { %1359 = vst [vmem:[#allocation3 + $0x40] sm:$0xff] (%p1346_p6), %v2711_v25  ;;  %1360 = vst [vmem:[#allocation3 + $0x48] sm:$0xff] (%p1346_p6), %v2711_v25 }
 0x2ae   : > { %1361 = vst [vmem:[#allocation3 + $0x50] sm:$0xff] (%p1346_p6), %v2711_v25  ;;  %1362 = vst [vmem:[#allocation3 + $0x58] sm:$0xff] (%p1346_p6), %v2711_v25 }
 0x2af   : > { %1363 = vst [vmem:[#allocation3 + $0x60] sm:$0xff] (%p1346_p6), %v2711_v25  ;;  %1364 = vst [vmem:[#allocation3 + $0x68] sm:$0xff] (%p1346_p6), %v2711_v25 }
 0x2b0   : > { %1365 = vst [vmem:[#allocation3 + $0x70] sm:$0xff] %v2711_v25  ;;  %1366 = vst [vmem:[#allocation3 + $0x78] sm:$0xff] %v2711_v25 }
 0x2b1 PF: > { %p2225_p7 = scmp.ne.s32.totalorder %s2698_s13, 1 }
 0x2b2   : > { %v1391_v26 = vld [vmem:[#allocation4] sm:$0xff] (!%p2225_p7)  ;;  %v1392_v28 = vld [vmem:[#allocation4 + $0x8] sm:$0xff] (!%p2225_p7)  ;;  %2459 = vmatprep.mubr.bf16.mxu0 (!%p2225_p7), %v522_v5  ;;  %2467 = vmatprep.mubr.bf16.mxu1 (!%p2225_p7), %v526_v9  ;;  %v1393_v51 = vld [vmem:[#allocation4 + $0x10] sm:$0xff] (!%p2225_p7) }
 0x2b3   : > { %1369 = sbr.rel (%p2225_p7) target bundleno = 949 (0x3b5), region = 84  ;;  %2443 = vmatprep.subr.bf16.mxu0 (!%p2225_p7), %v1391_v26  ;;  %2571 = vmatprep.subr.bf16.mxu1 (!%p2225_p7), %v1391_v26  ;;  %v1394_v52 = vld [vmem:[#allocation4 + $0x18] sm:$0xff] (!%p2225_p7)  ;;  %v1395_v5 = vld [vmem:[#allocation4 + $0x20] sm:$0xff] (!%p2225_p7)  ;;  %v1396_v9 = vld [vmem:[#allocation4 + $0x28] sm:$0xff] (!%p2225_p7) }
 0x2b4   : > { %2444 = vmatpush3.bf16.msra.mxu0 (!%p2225_p7), %v1391_v26  ;;  %2579 = vmatpush3.bf16.msra.mxu1 (!%p2225_p7), %v1391_v26  ;;  %v1397_v53 = vld [vmem:[#allocation4 + $0x30] sm:$0xff] (!%p2225_p7)  ;;  %v1398_v54 = vld [vmem:[#allocation4 + $0x38] sm:$0xff] (!%p2225_p7)  ;;  %v1371_v57 = vld [vmem:[#allocation3] sm:$0xff] (!%p2225_p7) }
 0x2b5   : > { %2445 = vmatprep.subr.bf16.mxu0 (!%p2225_p7), %v1392_v28  ;;  %2572 = vmatprep.subr.bf16.mxu1 (!%p2225_p7), %v1392_v28  ;;  %v1373_v55 = vld [vmem:[#allocation3 + $0x10] sm:$0xff] (!%p2225_p7)  ;;  %v1379_v1 = vld [vmem:[#allocation3 + $0x40] sm:$0xff] (!%p2225_p7)  ;;  %v1374_v3 = vld [vmem:[#allocation3 + $0x18] sm:$0xff] (!%p2225_p7) }
 0x2b6   : > { %v1381_v56 = vld [vmem:[#allocation3 + $0x50] sm:$0xff] (!%p2225_p7)  ;;  %v1372_v62 = vld [vmem:[#allocation3 + $0x8] sm:$0xff] (!%p2225_p7)  ;;  %v1375_v18 = vld [vmem:[#allocation3 + $0x20] sm:$0xff] (!%p2225_p7) }
 0x2b7   : > { %v1377_v17 = vld [vmem:[#allocation3 + $0x30] sm:$0xff] (!%p2225_p7)  ;;  %v1383_v29 = vld [vmem:[#allocation3 + $0x60] sm:$0xff] (!%p2225_p7)  ;;  %v1378_v32 = vld [vmem:[#allocation3 + $0x38] sm:$0xff] (!%p2225_p7) }
 0x2b8   : > { %2446 = vmatpush3.bf16.msra.mxu0 (!%p2225_p7), %v1392_v28  ;;  %2580 = vmatpush3.bf16.msra.mxu1 (!%p2225_p7), %v1392_v28  ;;  %v1385_v27 = vld [vmem:[#allocation3 + $0x70] sm:$0xff] (!%p2225_p7)  ;;  %v1386_v33 = vld [vmem:[#allocation3 + $0x78] sm:$0xff] (!%p2225_p7)  ;;  %v1376_v20 = vld [vmem:[#allocation3 + $0x28] sm:$0xff] (!%p2225_p7) }
 0x2b9   : > { %2447 = vmatprep.subr.bf16.mxu0 (!%p2225_p7), %v1393_v51  ;;  %2573 = vmatprep.subr.bf16.mxu1 (!%p2225_p7), %v1393_v51  ;;  %v1384_v37 = vld [vmem:[#allocation3 + $0x68] sm:$0xff] (!%p2225_p7) }
 0x2bc   : > { %2448 = vmatpush3.bf16.msra.mxu0 %v1393_v51  ;;  %2581 = vmatpush3.bf16.msra.mxu1 %v1393_v51 }
 0x2bd   : > { %2449 = vmatprep.subr.bf16.mxu0 %v1394_v52  ;;  %2574 = vmatprep.subr.bf16.mxu1 %v1394_v52 }
 0x2c0   : > { %2450 = vmatpush3.bf16.msra.mxu0 %v1394_v52  ;;  %2582 = vmatpush3.bf16.msra.mxu1 %v1394_v52 }
 0x2c1   : > { %2451 = vmatprep.subr.bf16.mxu0 %v1395_v5  ;;  %2575 = vmatprep.subr.bf16.mxu1 %v1395_v5 }
 0x2c4   : > { %2452 = vmatpush3.bf16.msra.mxu0 %v1395_v5  ;;  %2583 = vmatpush3.bf16.msra.mxu1 %v1395_v5 }
 0x2c5   : > { %2453 = vmatprep.subr.bf16.mxu0 %v1396_v9  ;;  %2576 = vmatprep.subr.bf16.mxu1 %v1396_v9 }
 0x2c8   : > { %2454 = vmatpush3.bf16.msra.mxu0 %v1396_v9  ;;  %2584 = vmatpush3.bf16.msra.mxu1 %v1396_v9 }
 0x2c9   : > { %2455 = vmatprep.subr.bf16.mxu0 %v1397_v53  ;;  %2577 = vmatprep.subr.bf16.mxu1 %v1397_v53 }
 0x2cc   : > { %2456 = vmatpush3.bf16.msra.mxu0 %v1397_v53  ;;  %2585 = vmatpush3.bf16.msra.mxu1 %v1397_v53 }
 0x2cd   : > { %2457 = vmatprep.subr.bf16.mxu0 %v1398_v54  ;;  %2578 = vmatprep.subr.bf16.mxu1 %v1398_v54 }
 0x2d0   : > { %2458 = vmatpush3.bf16.msra.mxu0 %v1398_v54  ;;  %2586 = vmatpush3.bf16.msra.mxu1 %v1398_v54 }
 0x2d3   : > { %2460 = vmatmul.mubr.bf16.vlgmr.msra.gmra.mrb[0].mxu0 %v523_v6  ;;  %2468 = vmatmul.mubr.bf16.vlgmr.msra.gmra.mrb[0].mxu1 %v527_v10  ;;  %v1382_v10 = vld [vmem:[#allocation3 + $0x58] sm:$0xff] }
 0x2d4   : > { %2463 = vmatprep.mubr.bf16.mxu0 %v524_v7  ;;  %2471 = vmatprep.mubr.bf16.mxu1 %v528_v11  ;;  %v1380_v11 = vld [vmem:[#allocation3 + $0x48] sm:$0xff] }
 0x2db   : > { %2464 = vmatmul.mubr.bf16.gmra.mrb[4].mxu0 %v525_v8  ;;  %2472 = vmatmul.mubr.bf16.gmra.mrb[4].mxu1 %v529_v12 }
 0x3a6   : > { %v2461_v6 = vpop.f32.mrb[0].mxu0  ;;  %v2469_v58 = vpop.f32.mrb[0].mxu1 }
 0x3a7   : > { %v1498_v59 = vadd.f32 %v2461_v6, %v1373_v55  ;;  %v1506_v60 = vadd.f32 %v2469_v58, %v1381_v56  ;;  %v1433_v7 = vpop.f32.mrb[1].mxu0  ;;  %v1465_v61 = vpop.f32.mrb[1].mxu1 }
 0x3a8   : > { %v1496_v63 = vadd.f32 %v1433_v7, %v1371_v57  ;;  %v1504_v2 = vadd.f32 %v1465_v61, %v1379_v1  ;;  %v2462_v8 = vpop.f32.mrb[2].mxu0  ;;  %v2470_v0 = vpop.f32.mrb[2].mxu1 }
 0x3a9   : > { %1514 = vst [vmem:[#allocation3 + $0x10] sm:$0xff] %v1498_v59  ;;  %1522 = vst [vmem:[#allocation3 + $0x50] sm:$0xff] %v1506_v60  ;;  %v1499_v4 = vadd.f32 %v2462_v8, %v1374_v3  ;;  %v1507_v12 = vadd.f32 %v2470_v0, %v1382_v10  ;;  %v1436_v13 = vpop.f32.mrb[3].mxu0  ;;  %v1468_v14 = vpop.f32.mrb[3].mxu1 }
 0x3aa   : > { %1512 = vst [vmem:[#allocation3] sm:$0xff] %v1496_v63  ;;  %1520 = vst [vmem:[#allocation3 + $0x40] sm:$0xff] %v1504_v2  ;;  %v1497_v15 = vadd.f32 %v1436_v13, %v1372_v62  ;;  %v1505_v16 = vadd.f32 %v1468_v14, %v1380_v11 }
 0x3ab   : > { %1515 = vst [vmem:[#allocation3 + $0x18] sm:$0xff] %v1499_v4  ;;  %1523 = vst [vmem:[#allocation3 + $0x58] sm:$0xff] %v1507_v12 }
 0x3ac   : > { %1513 = vst [vmem:[#allocation3 + $0x8] sm:$0xff] %v1497_v15  ;;  %1521 = vst [vmem:[#allocation3 + $0x48] sm:$0xff] %v1505_v16 }
 0x3ae   : > { %v2465_v30 = vpop.f32.mrb[4].mxu0  ;;  %v2473_v31 = vpop.f32.mrb[4].mxu1 }
 0x3af   : > { %v1502_v34 = vadd.f32 %v2465_v30, %v1377_v17  ;;  %v1510_v19 = vadd.f32 %v2473_v31, %v1385_v27  ;;  %v1449_v35 = vpop.f32.mrb[5].mxu0  ;;  %v1481_v36 = vpop.f32.mrb[5].mxu1 }
 0x3b0   : > { %v1500_v38 = vadd.f32 %v1449_v35, %v1375_v18  ;;  %v1508_v39 = vadd.f32 %v1481_v36, %v1383_v29  ;;  %v2466_v21 = vpop.f32.mrb[6].mxu0  ;;  %v2474_v40 = vpop.f32.mrb[6].mxu1 }
 0x3b1   : > { %1518 = vst [vmem:[#allocation3 + $0x30] sm:$0xff] %v1502_v34  ;;  %1526 = vst [vmem:[#allocation3 + $0x70] sm:$0xff] %v1510_v19  ;;  %v1503_v22 = vadd.f32 %v2466_v21, %v1378_v32  ;;  %v1511_v41 = vadd.f32 %v2474_v40, %v1386_v33  ;;  %v1452_v42 = vpop.f32.mrb[7].mxu0  ;;  %v1484_v43 = vpop.f32.mrb[7].mxu1 }
 0x3b2   : > { %1516 = vst [vmem:[#allocation3 + $0x20] sm:$0xff] %v1500_v38  ;;  %1524 = vst [vmem:[#allocation3 + $0x60] sm:$0xff] %v1508_v39  ;;  %v1501_v44 = vadd.f32 %v1452_v42, %v1376_v20  ;;  %v1509_v45 = vadd.f32 %v1484_v43, %v1384_v37 }
 0x3b3   : > { %1519 = vst [vmem:[#allocation3 + $0x38] sm:$0xff] %v1503_v22  ;;  %1527 = vst [vmem:[#allocation3 + $0x78] sm:$0xff] %v1511_v41 }
 0x3b4   : > { %1517 = vst [vmem:[#allocation3 + $0x28] sm:$0xff] %v1501_v44  ;;  %1525 = vst [vmem:[#allocation3 + $0x68] sm:$0xff] %v1509_v45 }
 0x3b5 PF: > { %1529 = sbr.rel (!%p1346_p6) target bundleno = 1334 (0x536), region = 88  ;;  %v1549_v23 = vld [vmem:[%s3276_s3 + $0x10] sm:$0xff] (%p1346_p6)  ;;  %v1547_v46 = vld [vmem:[%s3276_s3] sm:$0xff] (%p1346_p6)  ;;  %v2712_v47 = vmov (%p1346_p6), 0   ;;  %v1550_v48 = vld [vmem:[%s3276_s3 + $0x18] sm:$0xff] (%p1346_p6) }
 0x3b6   : > { %2667 = vset.pattern.permute.xlu1 (%p1346_p6), %v2712_v47  ;;  %2666 = vset.pattern.permute.xlu0 (%p1346_p6), %v2712_v47  ;;  %v1548_v24 = vld [vmem:[%s3276_s3 + $0x8] sm:$0xff] (%p1346_p6)  ;;  %v1551_v50 = vld [vmem:[%s3276_s3 + $0x20] sm:$0xff] (%p1346_p6)  ;;  %v1554_v51 = vld [vmem:[%s3276_s3 + $0x38] sm:$0xff] (%p1346_p6) }
 0x3b7   : > { %1575 = vperm.xlu1 (%p1346_p6), %2667, %v1549_v23   ;;  %1565 = vperm.xlu0 (%p1346_p6), %2666, %v1547_v46   ;;  %v1552_v49 = vld [vmem:[%s3276_s3 + $0x28] sm:$0xff] (%p1346_p6)  ;;  %v2668_v25 = vld [vmem:[%s3281_s8] sm:$0xff] (%p1346_p6)   ;;  %v1553_v5 = vld [vmem:[%s3276_s3 + $0x30] sm:$0xff] (%p1346_p6) }
 0x3b8   : > { %v2669_v26 = vld [vmem:[%s3280_s7] sm:$0xff] (%p1346_p6)   ;;  %2475 = vmatprep.subr.bf16.mxu1 (%p1346_p6), %v2668_v25  ;;  %v2670_v28 = vld [vmem:[%s3281_s8 + $0x8] sm:$0xff] (%p1346_p6)   ;;  %v2672_v9 = vld [vmem:[%s3281_s8 + $0x10] sm:$0xff] (%p1346_p6)  }
 0x3b9   : > { %2476 = vmatpush3.bf16.msra.mxu1 (%p1346_p6), %v2668_v25  ;;  %2507 = vmatprep.subr.bf16.mxu0 (%p1346_p6), %v2669_v26  ;;  %v2671_v52 = vld [vmem:[%s3280_s7 + $0x8] sm:$0xff] (%p1346_p6)   ;;  %v2673_v53 = vld [vmem:[%s3280_s7 + $0x10] sm:$0xff] (%p1346_p6)   ;;  %v1555_v55 = vld [vmem:[%s3276_s3 + $0x40] sm:$0xff] (%p1346_p6) }
 0x3ba   : > { %2477 = vmatprep.subr.bf16.mxu1 (%p1346_p6), %v2670_v28  ;;  %2508 = vmatpush3.bf16.msra.mxu0 (%p1346_p6), %v2669_v26  ;;  %v1556_v54 = vld [vmem:[%s3276_s3 + $0x48] sm:$0xff] (%p1346_p6)  ;;  %v2674_v56 = vld [vmem:[%s3281_s8 + $0x18] sm:$0xff] (%p1346_p6)   ;;  %v1557_v6 = vld [vmem:[%s3276_s3 + $0x50] sm:$0xff] (%p1346_p6) }
 0x3bb   : > { %1580 = vperm.xlu1 (%p1346_p6), %2667, %v1550_v48   ;;  %1570 = vperm.xlu0 (%p1346_p6), %2666, %v1548_v24   ;;  %v2675_v57 = vld [vmem:[%s3280_s7 + $0x18] sm:$0xff] (%p1346_p6)   ;;  %v2676_v58 = vld [vmem:[%s3281_s8 + $0x20] sm:$0xff] (%p1346_p6)   ;;  %v1560_v59 = vld [vmem:[%s3276_s3 + $0x68] sm:$0xff] (%p1346_p6) }
 0x3bc   : > { %2509 = vmatprep.subr.bf16.mxu0 %v2671_v52  ;;  %v1558_v1 = vld [vmem:[%s3276_s3 + $0x58] sm:$0xff]  ;;  %v2677_v3 = vld [vmem:[%s3280_s7 + $0x20] sm:$0xff]   ;;  %v2678_v7 = vld [vmem:[%s3281_s8 + $0x28] sm:$0xff]  }
 0x3bd   : > { %2478 = vmatpush3.bf16.msra.mxu1 %v2670_v28  ;;  %v1687_v10 = vld [vmem:[#allocation4] sm:$0xff]  ;;  %v2679_v61 = vld [vmem:[%s3280_s7 + $0x28] sm:$0xff]   ;;  %v1562_v62 = vld [vmem:[%s3276_s3 + $0x78] sm:$0xff] }
 0x3be   : > { %2479 = vmatprep.subr.bf16.mxu1 %v2672_v9  ;;  %2510 = vmatpush3.bf16.msra.mxu0 %v2671_v52  ;;  %v1559_v60 = vld [vmem:[%s3276_s3 + $0x60] sm:$0xff]  ;;  %v1561_v11 = vld [vmem:[%s3276_s3 + $0x70] sm:$0xff]  ;;  %v2682_v8 = vld [vmem:[%s3281_s8 + $0x38] sm:$0xff]  }
 0x3bf   : > { %1590 = vperm.xlu1 %2667, %v1552_v49   ;;  %1585 = vperm.xlu0 %2666, %v1551_v50   ;;  %v2680_v63 = vld [vmem:[%s3281_s8 + $0x30] sm:$0xff]   ;;  %v2683_v0 = vld [vmem:[%s3280_s7 + $0x38] sm:$0xff]   ;;  %v1688_v4 = vld [vmem:[#allocation4 + $0x8] sm:$0xff] }
 0x3c0   : > { %2511 = vmatprep.subr.bf16.mxu0 %v2673_v53  ;;  %2491 = vmatprep.mubr.bf16.mxu1 %v1687_v10  ;;  %v2681_v2 = vld [vmem:[%s3280_s7 + $0x30] sm:$0xff]   ;;  %v1690_v13 = vld [vmem:[#allocation4 + $0x18] sm:$0xff]  ;;  %v1691_v14 = vld [vmem:[#allocation4 + $0x20] sm:$0xff] }
 0x3c1   : > { %2480 = vmatpush3.bf16.msra.mxu1 %v2672_v9  ;;  %v1689_v12 = vld [vmem:[#allocation4 + $0x10] sm:$0xff]  ;;  %v1692_v15 = vld [vmem:[#allocation4 + $0x28] sm:$0xff]  ;;  %v1694_v17 = vld [vmem:[#allocation4 + $0x38] sm:$0xff] }
 0x3c2   : > { %2481 = vmatprep.subr.bf16.mxu1 %v2674_v56  ;;  %2512 = vmatpush3.bf16.msra.mxu0 %v2673_v53  ;;  %v1693_v16 = vld [vmem:[#allocation4 + $0x30] sm:$0xff]  ;;  %v1531_v30 = vld [vmem:[#allocation3] sm:$0xff]  ;;  %v1534_v31 = vld [vmem:[#allocation3 + $0x18] sm:$0xff] }
 0x3c3   : > { %1600 = vperm.xlu1 %2667, %v1554_v51   ;;  %1595 = vperm.xlu0 %2666, %v1553_v5   ;;  %v1533_v29 = vld [vmem:[#allocation3 + $0x10] sm:$0xff]  ;;  %v1532_v32 = vld [vmem:[#allocation3 + $0x8] sm:$0xff]  ;;  %v1535_v38 = vld [vmem:[#allocation3 + $0x20] sm:$0xff] }
 0x3c4   : > { %2513 = vmatprep.subr.bf16.mxu0 %v2675_v57  ;;  %v1536_v37 = vld [vmem:[#allocation3 + $0x28] sm:$0xff]  ;;  %v1538_v43 = vld [vmem:[#allocation3 + $0x38] sm:$0xff]  ;;  %v1537_v44 = vld [vmem:[#allocation3 + $0x30] sm:$0xff] }
 0x3c5   : > { %2482 = vmatpush3.bf16.msra.mxu1 %v2674_v56  ;;  %v1540_v24 = vld [vmem:[#allocation3 + $0x48] sm:$0xff]  ;;  %v1539_v49 = vld [vmem:[#allocation3 + $0x40] sm:$0xff]  ;;  %v1542_v52 = vld [vmem:[#allocation3 + $0x58] sm:$0xff] }
 0x3c6   : > { %2483 = vmatprep.subr.bf16.mxu1 %v2676_v58  ;;  %2514 = vmatpush3.bf16.msra.mxu0 %v2675_v57  ;;  %v1541_v5 = vld [vmem:[#allocation3 + $0x50] sm:$0xff]  ;;  %v1544_v57 = vld [vmem:[#allocation3 + $0x68] sm:$0xff] }
 0x3c7   : > { %1610 = vperm.xlu1 %2667, %v1556_v54   ;;  %1605 = vperm.xlu0 %2666, %v1555_v55  }
 0x3c8   : > { %2515 = vmatprep.subr.bf16.mxu0 %v2677_v3 }
 0x3c9   : > { %2484 = vmatpush3.bf16.msra.mxu1 %v2676_v58 }
 0x3ca   : > { %2485 = vmatprep.subr.bf16.mxu1 %v2678_v7  ;;  %2516 = vmatpush3.bf16.msra.mxu0 %v2677_v3 }
 0x3cb   : > { %1620 = vperm.xlu1 %2667, %v1558_v1   ;;  %1615 = vperm.xlu0 %2666, %v1557_v6   ;;  %v1543_v1 = vld [vmem:[#allocation3 + $0x60] sm:$0xff] }
 0x3cc   : > { %2517 = vmatprep.subr.bf16.mxu0 %v2679_v61 }
 0x3cd   : > { %2486 = vmatpush3.bf16.msra.mxu1 %v2678_v7  ;;  %v1545_v7 = vld [vmem:[#allocation3 + $0x70] sm:$0xff] }
 0x3ce   : > { %2487 = vmatprep.subr.bf16.mxu1 %v2680_v63  ;;  %2518 = vmatpush3.bf16.msra.mxu0 %v2679_v61 }
 0x3cf   : > { %1630 = vperm.xlu1 %2667, %v1560_v59   ;;  %1625 = vperm.xlu0 %2666, %v1559_v60   ;;  %v1546_v60 = vld [vmem:[#allocation3 + $0x78] sm:$0xff] }
 0x3d0   : > { %2519 = vmatprep.subr.bf16.mxu0 %v2681_v2 }
 0x3d1   : > { %2488 = vmatpush3.bf16.msra.mxu1 %v2680_v63 }
 0x3d2   : > { %2489 = vmatprep.subr.bf16.mxu1 %v2682_v8  ;;  %2520 = vmatpush3.bf16.msra.mxu0 %v2681_v2 }
 0x3d3   : > { %1640 = vperm.xlu1 %2667, %v1562_v62   ;;  %1635 = vperm.xlu0 %2666, %v1561_v11  }
 0x3d4   : > { %2521 = vmatprep.subr.bf16.mxu0 %v2683_v0 }
 0x3d5   : > { %2490 = vmatpush3.bf16.msra.mxu1 %v2682_v8 }
 0x3d6   : > { %2522 = vmatpush3.bf16.msra.mxu0 %v2683_v0 }
 0x3d8   : > { %2492 = vmatmul.mubr.bf16.vlgmr.msra.gmra.mrb[0].mxu1 %v1688_v4 }
 0x3d9   : > { %2495 = vmatprep.mubr.bf16.mxu1 %v1689_v12 }
 0x3e0   : > { %2496 = vmatmul.mubr.bf16.gmra.mrb[4].mxu1 %v1690_v13 }
 0x3e1   : > { %2499 = vmatprep.mubr.bf16.mxu1 %v1691_v14 }
 0x3e8   : > { %2500 = vmatmul.mubr.bf16.gmra.mrb[8].mxu1 %v1692_v15 }
 0x3e9   : > { %2503 = vmatprep.mubr.bf16.mxu1 %v1693_v16 }
 0x3f0   : > { %2504 = vmatmul.mubr.bf16.gmra.mrb[12].mxu1 %v1694_v17 }
 0x436   : > { %v1576_v27 = vpop.permute.xlu1 %1575  ;;  %v1566_v18 = vpop.permute.xlu0 %1565 }
 0x437   : > { %v1645_v19 = vmul.f32 %v1576_v27, %v1533_v29  ;;  %v1643_v35 = vmul.f32 %v1566_v18, %v1531_v30 }
 0x43a   : > { %v1581_v33 = vpop.permute.xlu1 %1580  ;;  %v1571_v34 = vpop.permute.xlu0 %1570 }
 0x43b   : > { %v1646_v36 = vmul.f32 %v1581_v33, %v1534_v31  ;;  %v1644_v20 = vmul.f32 %v1571_v34, %v1532_v32 }
 0x43d   : > { %v1660_v39 = vpack.c.bf16 %v1646_v36, %v1645_v19  ;;  %v1659_v21 = vpack.c.bf16 %v1644_v20, %v1643_v35  ;;  %v3194_v35 = vld [vmem:[%s3282_s9] ss:$0 sm:$0xff] }
 0x43e   : > { %v1591_v40 = vpop.permute.xlu1 %1590  ;;  %v1586_v22 = vpop.permute.xlu0 %1585 }
 0x43f   : > { %v1648_v41 = vmul.f32 %v1591_v40, %v1536_v37  ;;  %v1647_v42 = vmul.f32 %v1586_v22, %v1535_v38  ;;  %2523 = vmatprep.mubr.bf16.mxu0 %v1659_v21 }
 0x440   : > { %2524 = vmatmul.mubr.bf16.vlgmr.msra.gmra.mrb[0].mxu0 %v1660_v39 }
 0x441   : > { %v1661_v45 = vpack.c.bf16 %v1648_v41, %v1647_v42 }
 0x442   : > { %v1601_v23 = vpop.permute.xlu1 %1600  ;;  %v1596_v46 = vpop.permute.xlu0 %1595 }
 0x443   : > { %v1650_v47 = vmul.f32 %v1601_v23, %v1538_v43  ;;  %v1649_v48 = vmul.f32 %v1596_v46, %v1537_v44  ;;  %2527 = vmatprep.mubr.bf16.mxu0 %v1661_v45 }
 0x445   : > { %v1662_v50 = vpack.c.bf16 %v1650_v47, %v1649_v48 }
 0x446   : > { %v1611_v25 = vpop.permute.xlu1 %1610  ;;  %v1606_v26 = vpop.permute.xlu0 %1605 }
 0x447   : > { %v1652_v28 = vmul.f32 %v1611_v25, %v1540_v24  ;;  %v1651_v51 = vmul.f32 %v1606_v26, %v1539_v49 }
 0x448   : > { %2528 = vmatmul.mubr.bf16.gmra.mrb[4].mxu0 %v1662_v50 }
 0x449   : > { %v1663_v9 = vpack.c.bf16 %v1652_v28, %v1651_v51 }
 0x44a   : > { %v1621_v53 = vpop.permute.xlu1 %1620  ;;  %v1616_v54 = vpop.permute.xlu0 %1615 }
 0x44b   : > { %v1654_v55 = vmul.f32 %v1621_v53, %v1542_v52  ;;  %v1653_v56 = vmul.f32 %v1616_v54, %v1541_v5  ;;  %2531 = vmatprep.mubr.bf16.mxu0 %v1663_v9 }
 0x44d   : > { %v1664_v6 = vpack.c.bf16 %v1654_v55, %v1653_v56 }
 0x44e   : > { %v1631_v58 = vpop.permute.xlu1 %1630  ;;  %v1626_v3 = vpop.permute.xlu0 %1625 }
 0x44f   : > { %v1656_v10 = vmul.f32 %v1631_v58, %v1544_v57  ;;  %v1655_v59 = vmul.f32 %v1626_v3, %v1543_v1 }
 0x450   : > { %2532 = vmatmul.mubr.bf16.gmra.mrb[8].mxu0 %v1664_v6 }
 0x451   : > { %v1665_v61 = vpack.c.bf16 %v1656_v10, %v1655_v59 }
 0x452   : > { %v1641_v62 = vpop.permute.xlu1 %1640  ;;  %v1636_v11 = vpop.permute.xlu0 %1635 }
 0x453   : > { %v1658_v63 = vmul.f32 %v1641_v62, %v1546_v60  ;;  %v1657_v2 = vmul.f32 %v1636_v11, %v1545_v7  ;;  %2535 = vmatprep.mubr.bf16.mxu0 %v1665_v61 }
 0x455   : > { %v1666_v8 = vpack.c.bf16 %v1658_v63, %v1657_v2 }
 0x458   : > { %2536 = vmatmul.mubr.bf16.gmra.mrb[12].mxu0 %v1666_v8 }
 0x4ab   : > { %v2493_v0 = vpop.f32.mrb[0].mxu1 }
 0x4ac   : > { %v1793_v4 = vpop.f32.mrb[1].mxu1 }
 0x4ad   : > { %v2494_v12 = vpop.f32.mrb[2].mxu1 }
 0x4ae   : > { %v1796_v13 = vpop.f32.mrb[3].mxu1 }
 0x4b3   : > { %v2497_v14 = vpop.f32.mrb[4].mxu1 }
 0x4b4   : > { %v1809_v15 = vpop.f32.mrb[5].mxu1 }
 0x4b5   : > { %v2498_v16 = vpop.f32.mrb[6].mxu1 }
 0x4b6   : > { %v1812_v17 = vpop.f32.mrb[7].mxu1 }
 0x4bb   : > { %v2501_v27 = vpop.f32.mrb[8].mxu1 }
 0x4bc   : > { %v1825_v18 = vpop.f32.mrb[9].mxu1 }
 0x4bd   : > { %v2502_v29 = vpop.f32.mrb[10].mxu1 }
 0x4be   : > { %v1828_v30 = vpop.f32.mrb[11].mxu1 }
 0x4c3   : > { %v3183_v31 = vpop.f32.mrb[12].mxu1 }
 0x4c4   : > { %v3185_v32 = vpop.f32.mrb[13].mxu1 }
 0x4c5   : > { %v3187_v33 = vpop.f32.mrb[14].mxu1 }
 0x4c6   : > { %v3189_v34 = vpop.f32.mrb[15].mxu1 }
 0x513   : > { %v2525_v19 = vpop.f32.mrb[0].mxu0 }
 0x514   : > { %v1947_v36 = vadd.f32 %v2525_v19, %v2493_v0  ;;  %v1938_v20 = vpop.f32.mrb[1].mxu0 }
 0x515   : > { %v1939_v37 = vadd.f32 %v1938_v20, %v1793_v4  ;;  %v2526_v38 = vpop.f32.mrb[2].mxu0 }
 0x516   : > { %v2010_v39 = vadd.f32 %v3194_v35, %v1947_v36  ;;  %v1950_v21 = vadd.f32 %v2526_v38, %v2494_v12  ;;  %v1941_v40 = vpop.f32.mrb[3].mxu0 }
 0x517   : > { %v2008_v22 = vadd.f32 %v3194_v35, %v1939_v37  ;;  %v1942_v41 = vadd.f32 %v1941_v40, %v1796_v13 }
 0x518   : > { %v2026_v42 = vmax.f32 %v2010_v39, 0.0  ;;  %v2011_v43 = vadd.f32 %v3194_v35, %v1950_v21 }
 0x519   : > { %v2024_v44 = vmax.f32 %v2008_v22, 0.0  ;;  %v2009_v45 = vadd.f32 %v3194_v35, %v1942_v41 }
 0x51a   : > { %2042 = vst [vmem:[%s3283_s10 + $0x10] sm:$0xff] %v2026_v42  ;;  %v2027_v23 = vmax.f32 %v2011_v43, 0.0 }
 0x51b   : > { %2040 = vst [vmem:[%s3283_s10] sm:$0xff] %v2024_v44  ;;  %v2025_v46 = vmax.f32 %v2009_v45, 0.0  ;;  %v2529_v47 = vpop.f32.mrb[4].mxu0 }
 0x51c   : > { %2043 = vst [vmem:[%s3283_s10 + $0x18] sm:$0xff] %v2027_v23  ;;  %v1963_v48 = vadd.f32 %v2529_v47, %v2497_v14  ;;  %v1954_v24 = vpop.f32.mrb[5].mxu0 }
 0x51d   : > { %2041 = vst [vmem:[%s3283_s10 + $0x8] sm:$0xff] %v2025_v46  ;;  %v1955_v49 = vadd.f32 %v1954_v24, %v1809_v15  ;;  %v2530_v50 = vpop.f32.mrb[6].mxu0 }
 0x51e   : > { %v2014_v25 = vadd.f32 %v3194_v35, %v1963_v48  ;;  %v1966_v26 = vadd.f32 %v2530_v50, %v2498_v16  ;;  %v1957_v28 = vpop.f32.mrb[7].mxu0 }
 0x51f   : > { %v2012_v51 = vadd.f32 %v3194_v35, %v1955_v49  ;;  %v1958_v52 = vadd.f32 %v1957_v28, %v1812_v17 }
 0x520   : > { %v2030_v5 = vmax.f32 %v2014_v25, 0.0  ;;  %v2015_v9 = vadd.f32 %v3194_v35, %v1966_v26 }
 0x521   : > { %v2028_v53 = vmax.f32 %v2012_v51, 0.0  ;;  %v2013_v54 = vadd.f32 %v3194_v35, %v1958_v52 }
 0x522   : > { %2046 = vst [vmem:[%s3283_s10 + $0x30] sm:$0xff] %v2030_v5  ;;  %v2031_v55 = vmax.f32 %v2015_v9, 0.0 }
 0x523   : > { %2044 = vst [vmem:[%s3283_s10 + $0x20] sm:$0xff] %v2028_v53  ;;  %v2029_v56 = vmax.f32 %v2013_v54, 0.0  ;;  %v2533_v57 = vpop.f32.mrb[8].mxu0 }
 0x524   : > { %2047 = vst [vmem:[%s3283_s10 + $0x38] sm:$0xff] %v2031_v55  ;;  %v1979_v1 = vadd.f32 %v2533_v57, %v2501_v27  ;;  %v1970_v6 = vpop.f32.mrb[9].mxu0 }
 0x525   : > { %2045 = vst [vmem:[%s3283_s10 + $0x28] sm:$0xff] %v2029_v56  ;;  %v1971_v58 = vadd.f32 %v1970_v6, %v1825_v18  ;;  %v2534_v3 = vpop.f32.mrb[10].mxu0 }
 0x526   : > { %v2018_v10 = vadd.f32 %v3194_v35, %v1979_v1  ;;  %v1982_v59 = vadd.f32 %v2534_v3, %v2502_v29  ;;  %v1973_v60 = vpop.f32.mrb[11].mxu0 }
 0x527   : > { %v2016_v7 = vadd.f32 %v3194_v35, %v1971_v58  ;;  %v1974_v61 = vadd.f32 %v1973_v60, %v1828_v30 }
 0x528   : > { %v2034_v62 = vmax.f32 %v2018_v10, 0.0  ;;  %v2019_v11 = vadd.f32 %v3194_v35, %v1982_v59 }
 0x529   : > { %v2032_v63 = vmax.f32 %v2016_v7, 0.0  ;;  %v2017_v2 = vadd.f32 %v3194_v35, %v1974_v61 }
 0x52a   : > { %2050 = vst [vmem:[%s3283_s10 + $0x50] sm:$0xff] %v2034_v62  ;;  %v2035_v8 = vmax.f32 %v2019_v11, 0.0 }
 0x52b   : > { %2048 = vst [vmem:[%s3283_s10 + $0x40] sm:$0xff] %v2032_v63  ;;  %v2033_v0 = vmax.f32 %v2017_v2, 0.0  ;;  %v2537_v4 = vpop.f32.mrb[12].mxu0 }
 0x52c   : > { %2051 = vst [vmem:[%s3283_s10 + $0x58] sm:$0xff] %v2035_v8  ;;  %v1995_v12 = vadd.f32 %v2537_v4, %v3183_v31  ;;  %v1986_v13 = vpop.f32.mrb[13].mxu0 }
 0x52d   : > { %2049 = vst [vmem:[%s3283_s10 + $0x48] sm:$0xff] %v2033_v0  ;;  %v1987_v14 = vadd.f32 %v1986_v13, %v3185_v32  ;;  %v2538_v15 = vpop.f32.mrb[14].mxu0 }
 0x52e   : > { %v2022_v16 = vadd.f32 %v3194_v35, %v1995_v12  ;;  %v1998_v17 = vadd.f32 %v2538_v15, %v3187_v33  ;;  %v1989_v27 = vpop.f32.mrb[15].mxu0 }
 0x52f   : > { %v2020_v18 = vadd.f32 %v3194_v35, %v1987_v14  ;;  %v1990_v29 = vadd.f32 %v1989_v27, %v3189_v34 }
 0x530   : > { %v2038_v30 = vmax.f32 %v2022_v16, 0.0  ;;  %v2023_v31 = vadd.f32 %v3194_v35, %v1998_v17 }
 0x531   : > { %v2036_v19 = vmax.f32 %v2020_v18, 0.0  ;;  %v2021_v36 = vadd.f32 %v3194_v35, %v1990_v29 }
 0x532   : > { %2054 = vst [vmem:[%s3283_s10 + $0x70] sm:$0xff] %v2038_v30  ;;  %v2039_v32 = vmax.f32 %v2023_v31, 0.0 }
 0x533   : > { %2052 = vst [vmem:[%s3283_s10 + $0x60] sm:$0xff] %v2036_v19  ;;  %v2037_v33 = vmax.f32 %v2021_v36, 0.0 }
 0x534   : > { %2055 = vst [vmem:[%s3283_s10 + $0x78] sm:$0xff] %v2039_v32 }
 0x535   : > { %2053 = vst [vmem:[%s3283_s10 + $0x68] sm:$0xff] %v2037_v33 }
 0x536 PF: > { %s20_s15 = sadd.s32 1, %s2706_s15   ;;  %s3284_s13 = smov %s2702_s14 }
 0x537   : > { %p17_p8 = scmp.ge.s32.totalorder %s20_s15, 4   ;;  %s3285_s14 = smov %s3287_s16 }
 0x539   :  { %19 = sbr.rel (!%p17_p8) target bundleno = 2 (0x2), region = 130 }

</bundles_post_ra>
